<compile_context>
chip_gen: v7x
topology: tpu7x:2x2x1
jax: 0.10.0
libtpu: 0.0.40
codegen_flags: <defaults>
</compile_context>

<pallas_src>
import jax
import jax.numpy as jnp
import numpy as np
from jax.experimental import pallas as pl
from jax.experimental.pallas import tpu as pltpu


def _shmoof_kernel(ktab_ref, idx_ref, mask_ref, site_ref, rates_ref):
    """One grid step processes a (Bt, Lp) tile of batch rows.

    ktab_ref  : (Kc,)    f32   SMEM-resident k-mer embedding table
    idx_ref   : (Bt, Lp) int16 k-mer indices
    mask_ref  : (Bt, Lp) int8  binary mask
    site_ref  : (1, Lp)  f32   per-site log rates (log_site_rates.weight.T)
    rates_ref : (Bt, Lp) f32
    """
    idx = idx_ref[...].astype(jnp.int32)                 # (Bt, Lp)
    kc = ktab_ref.shape[0]

    # Embedding gather as a select-scan against the SMEM table: one VPU
    # compare+select per table entry over the whole tile.  No (Bt, Lp, Kc)
    # intermediate, no XLU reduce, no spilled half-empty vregs.
    log_kmer = jnp.full(idx.shape, ktab_ref[0], jnp.float32)
    if kc <= 256:
        # Kc is a compile-time constant (64 for 3-mers): fully unrolled.
        for k in range(1, kc):
            log_kmer = jnp.where(idx == k, ktab_ref[k], log_kmer)
    else:
        # TODO(synk): for large tables (e.g. 5-mers, Kc~1024) a true lane
        # dynamic-gather (or an XLA-side gather feeding a pure elementwise
        # kernel) would beat this linear scan.
        def body(k, acc):
            return jnp.where(idx == k, ktab_ref[k], acc)
        log_kmer = jax.lax.fori_loop(1, kc, body, log_kmer)

    # Fused epilogue: add per-site log rates (broadcast over rows), apply the
    # binary mask, exponentiate (EUP).
    mask = mask_ref[...].astype(jnp.float32)              # (Bt, Lp)
    site = site_ref[...]                                   # (1, Lp)
    rates_ref[...] = jnp.exp((log_kmer + site) * mask)


def _round_up(x, m):
    return int(pl.cdiv(x, m) * m)


def _choose_row_tile(batch):
    """One large row tile per step.

    Multiple of 32 (int8 mask sublane packing), capped at 512 rows: small
    batches run as a single big step (no per-step overhead on the single-TC
    v5e/v6e), large batches still produce >=2 parallel 512-row steps for
    v7x's two TensorCores while staying far under any generation's VMEM limit.
    """
    return min(512, _round_up(max(batch, 1), 32))


def shmoof_forward(encoded_parents, masks, wt_base_modifier, params):
    """JAX/Pallas equivalent of SHMoofModel.forward.

    encoded_parents : (B, L) int    k-mer indices
    masks           : (B, L)        binary mask (any numeric/bool dtype)
    wt_base_modifier: unused by SHMoofModel.forward (kept for signature parity)
    params          : {'kmer_emb': (kmer_count, 1), 'log_site_rates': (site_count, 1)}
    Returns rates (B, L) f32.
    """
    del wt_base_modifier  # not used by this model's forward
    B, L = encoded_parents.shape

    kmer_table = params['kmer_emb'].reshape(-1).astype(jnp.float32)            # (Kc,)
    site_rates = params['log_site_rates'].reshape(1, -1).astype(jnp.float32)   # (1, L)
    Kc = kmer_table.shape[0]
    assert site_rates.shape[1] == L, "site_count must equal sequence length"

    Bt = _choose_row_tile(B)
    B_pad = _round_up(B, Bt)
    L_pad = _round_up(L, 128)          # lane-dense, unmasked full-lane stores

    # Narrow dtypes for HBM traffic: ids as int16 (Kc << 32768); mask as int8
    # (SHMoof masks are binary {0,1}).  Padded rows/cols give exp(0)=1 and are
    # sliced off below.
    idx = jnp.pad(encoded_parents.astype(jnp.int16),
                  ((0, B_pad - B), (0, L_pad - L)))
    msk = jnp.pad((masks != 0).astype(jnp.int8),
                  ((0, B_pad - B), (0, L_pad - L)))
    site = jnp.pad(site_rates, ((0, 0), (0, L_pad - L)))

    rates = pl.pallas_call(
        _shmoof_kernel,
        out_shape=jax.ShapeDtypeStruct((B_pad, L_pad), jnp.float32),
        grid=(B_pad // Bt,),
        in_specs=[
            # whole k-mer table, resident in SMEM (scalar-indexed reads)
            pl.BlockSpec(memory_space=pltpu.MemorySpace.SMEM),
            pl.BlockSpec((Bt, L_pad), lambda b: (b, 0)),   # k-mer id tile
            pl.BlockSpec((Bt, L_pad), lambda b: (b, 0)),   # mask tile
            pl.BlockSpec((1, L_pad), lambda b: (0, 0)),    # per-site log rates (resident)
        ],
        out_specs=pl.BlockSpec((Bt, L_pad), lambda b: (b, 0)),
        compiler_params=pltpu.CompilerParams(
            dimension_semantics=("parallel",)),
    )(kmer_table, idx, msk, site)

    return rates[:B, :L]


def reference_forward(encoded_parents, masks, params):
    """Pure-JAX reference mirroring the PyTorch forward."""
    log_kmer = params['kmer_emb'][encoded_parents][..., 0]        # (B, L)
    log_site = params['log_site_rates'][:, 0][None, :]            # (1, L)
    return jnp.exp((log_kmer + log_site) * masks)


if __name__ == "__main__":
    key = jax.random.PRNGKey(0)

    # Small shapes consistent with the module: kmer_length=3 -> 64 k-mers,
    # site_count == sequence length (required by the broadcast in forward).
    kmer_length = 3
    kmer_count = 4 ** kmer_length          # stand-in for len(generate_kmers(3))
    B = 16                                 # batch
    L = site_count = 128                   # sequence length / site_count

    ks = jax.random.split(key, 5)
    params = {
        'kmer_emb':       jax.random.normal(ks[0], (kmer_count, 1), jnp.float32) * 0.5,
        'log_site_rates': jax.random.normal(ks[1], (site_count, 1), jnp.float32) * 0.5,
    }

    encoded_parents = jax.random.randint(ks[2], (B, L), 0, kmer_count, jnp.int32)
    masks = (jax.random.uniform(ks[3], (B, L)) > 0.1).astype(jnp.float32)
    # wt_base_modifier: present in the forward signature but unused by SHMoofModel.
    wt_pos = jax.random.randint(ks[4], (B, L), 0, 4)
    wt_base_modifier = -10.0 * jax.nn.one_hot(wt_pos, 4, dtype=jnp.float32)

    rates = shmoof_forward(encoded_parents, masks, wt_base_modifier, params)
    jax.block_until_ready(rates)

    rates_ref = reference_forward(encoded_parents, masks, params)
    np.testing.assert_allclose(np.asarray(rates), np.asarray(rates_ref),
                               rtol=1e-4, atol=1e-5)

    print("KERNEL_OK")
</pallas_src>

<mosaic_0001>
module attributes {stable_mosaic.version = 11 : i64} {
  func.func @_shmoof_kernel(%arg0: i32, %arg1: memref<64xf32, #tpu.memory_space<smem>>, %arg2: memref<32x128xi16, #tpu.memory_space<vmem>>, %arg3: memref<32x128xi8, #tpu.memory_space<vmem>>, %arg4: memref<1x128xf32, #tpu.memory_space<vmem>>, %arg5: memref<32x128xf32, #tpu.memory_space<vmem>>) attributes {dimension_semantics = [#tpu.dimension_semantics<parallel>], iteration_bounds = array<i64: 1>, scalar_prefetch = 0 : i64, scratch_operands = 0 : i64, tpu.core_type = #tpu.core_type<tc>, window_params = [{transform_indices = @transform_0, window_bounds = array<i64: 64>}, {transform_indices = @transform_1, window_bounds = array<i64: 32, 128>}, {transform_indices = @transform_2, window_bounds = array<i64: 32, 128>}, {pipeline_mode = #tpu.pipeline_mode<synchronous>, transform_indices = @transform_3, window_bounds = array<i64: 1, 128>}, {transform_indices = @transform_4, window_bounds = array<i64: 32, 128>}]} {
    %c0 = arith.constant 0 : index
    %c0_0 = arith.constant 0 : index
    %0 = vector.load %arg2[%c0, %c0_0] : memref<32x128xi16, #tpu.memory_space<vmem>>, vector<32x128xi16>
    %1 = arith.extsi %0 : vector<32x128xi16> to vector<32x128xi32>
    %c0_1 = arith.constant 0 : index
    %2 = memref.load %arg1[%c0_1] : memref<64xf32, #tpu.memory_space<smem>>
    %3 = vector.broadcast %2 : f32 to vector<32x128xf32>
    %c1_i32 = arith.constant 1 : i32
    %4 = vector.broadcast %c1_i32 : i32 to vector<32x128xi32>
    %5 = arith.cmpi eq, %1, %4 : vector<32x128xi32>
    %c1 = arith.constant 1 : index
    %6 = memref.load %arg1[%c1] : memref<64xf32, #tpu.memory_space<smem>>
    %7 = vector.broadcast %6 : f32 to vector<32x128xf32>
    %8 = arith.select %5, %7, %3 : vector<32x128xi1>, vector<32x128xf32>
    %c2_i32 = arith.constant 2 : i32
    %9 = vector.broadcast %c2_i32 : i32 to vector<32x128xi32>
    %10 = arith.cmpi eq, %1, %9 : vector<32x128xi32>
    %c2 = arith.constant 2 : index
    %11 = memref.load %arg1[%c2] : memref<64xf32, #tpu.memory_space<smem>>
    %12 = vector.broadcast %11 : f32 to vector<32x128xf32>
    %13 = arith.select %10, %12, %8 : vector<32x128xi1>, vector<32x128xf32>
    %c3_i32 = arith.constant 3 : i32
    %14 = vector.broadcast %c3_i32 : i32 to vector<32x128xi32>
    %15 = arith.cmpi eq, %1, %14 : vector<32x128xi32>
    %c3 = arith.constant 3 : index
    %16 = memref.load %arg1[%c3] : memref<64xf32, #tpu.memory_space<smem>>
    %17 = vector.broadcast %16 : f32 to vector<32x128xf32>
    %18 = arith.select %15, %17, %13 : vector<32x128xi1>, vector<32x128xf32>
    %c4_i32 = arith.constant 4 : i32
    %19 = vector.broadcast %c4_i32 : i32 to vector<32x128xi32>
    %20 = arith.cmpi eq, %1, %19 : vector<32x128xi32>
    %c4 = arith.constant 4 : index
    %21 = memref.load %arg1[%c4] : memref<64xf32, #tpu.memory_space<smem>>
    %22 = vector.broadcast %21 : f32 to vector<32x128xf32>
    %23 = arith.select %20, %22, %18 : vector<32x128xi1>, vector<32x128xf32>
    %c5_i32 = arith.constant 5 : i32
    %24 = vector.broadcast %c5_i32 : i32 to vector<32x128xi32>
    %25 = arith.cmpi eq, %1, %24 : vector<32x128xi32>
    %c5 = arith.constant 5 : index
    %26 = memref.load %arg1[%c5] : memref<64xf32, #tpu.memory_space<smem>>
    %27 = vector.broadcast %26 : f32 to vector<32x128xf32>
    %28 = arith.select %25, %27, %23 : vector<32x128xi1>, vector<32x128xf32>
    %c6_i32 = arith.constant 6 : i32
    %29 = vector.broadcast %c6_i32 : i32 to vector<32x128xi32>
    %30 = arith.cmpi eq, %1, %29 : vector<32x128xi32>
    %c6 = arith.constant 6 : index
    %31 = memref.load %arg1[%c6] : memref<64xf32, #tpu.memory_space<smem>>
    %32 = vector.broadcast %31 : f32 to vector<32x128xf32>
    %33 = arith.select %30, %32, %28 : vector<32x128xi1>, vector<32x128xf32>
    %c7_i32 = arith.constant 7 : i32
    %34 = vector.broadcast %c7_i32 : i32 to vector<32x128xi32>
    %35 = arith.cmpi eq, %1, %34 : vector<32x128xi32>
    %c7 = arith.constant 7 : index
    %36 = memref.load %arg1[%c7] : memref<64xf32, #tpu.memory_space<smem>>
    %37 = vector.broadcast %36 : f32 to vector<32x128xf32>
    %38 = arith.select %35, %37, %33 : vector<32x128xi1>, vector<32x128xf32>
    %c8_i32 = arith.constant 8 : i32
    %39 = vector.broadcast %c8_i32 : i32 to vector<32x128xi32>
    %40 = arith.cmpi eq, %1, %39 : vector<32x128xi32>
    %c8 = arith.constant 8 : index
    %41 = memref.load %arg1[%c8] : memref<64xf32, #tpu.memory_space<smem>>
    %42 = vector.broadcast %41 : f32 to vector<32x128xf32>
    %43 = arith.select %40, %42, %38 : vector<32x128xi1>, vector<32x128xf32>
    %c9_i32 = arith.constant 9 : i32
    %44 = vector.broadcast %c9_i32 : i32 to vector<32x128xi32>
    %45 = arith.cmpi eq, %1, %44 : vector<32x128xi32>
    %c9 = arith.constant 9 : index
    %46 = memref.load %arg1[%c9] : memref<64xf32, #tpu.memory_space<smem>>
    %47 = vector.broadcast %46 : f32 to vector<32x128xf32>
    %48 = arith.select %45, %47, %43 : vector<32x128xi1>, vector<32x128xf32>
    %c10_i32 = arith.constant 10 : i32
    %49 = vector.broadcast %c10_i32 : i32 to vector<32x128xi32>
    %50 = arith.cmpi eq, %1, %49 : vector<32x128xi32>
    %c10 = arith.constant 10 : index
    %51 = memref.load %arg1[%c10] : memref<64xf32, #tpu.memory_space<smem>>
    %52 = vector.broadcast %51 : f32 to vector<32x128xf32>
    %53 = arith.select %50, %52, %48 : vector<32x128xi1>, vector<32x128xf32>
    %c11_i32 = arith.constant 11 : i32
    %54 = vector.broadcast %c11_i32 : i32 to vector<32x128xi32>
    %55 = arith.cmpi eq, %1, %54 : vector<32x128xi32>
    %c11 = arith.constant 11 : index
    %56 = memref.load %arg1[%c11] : memref<64xf32, #tpu.memory_space<smem>>
    %57 = vector.broadcast %56 : f32 to vector<32x128xf32>
    %58 = arith.select %55, %57, %53 : vector<32x128xi1>, vector<32x128xf32>
    %c12_i32 = arith.constant 12 : i32
    %59 = vector.broadcast %c12_i32 : i32 to vector<32x128xi32>
    %60 = arith.cmpi eq, %1, %59 : vector<32x128xi32>
    %c12 = arith.constant 12 : index
    %61 = memref.load %arg1[%c12] : memref<64xf32, #tpu.memory_space<smem>>
    %62 = vector.broadcast %61 : f32 to vector<32x128xf32>
    %63 = arith.select %60, %62, %58 : vector<32x128xi1>, vector<32x128xf32>
    %c13_i32 = arith.constant 13 : i32
    %64 = vector.broadcast %c13_i32 : i32 to vector<32x128xi32>
    %65 = arith.cmpi eq, %1, %64 : vector<32x128xi32>
    %c13 = arith.constant 13 : index
    %66 = memref.load %arg1[%c13] : memref<64xf32, #tpu.memory_space<smem>>
    %67 = vector.broadcast %66 : f32 to vector<32x128xf32>
    %68 = arith.select %65, %67, %63 : vector<32x128xi1>, vector<32x128xf32>
    %c14_i32 = arith.constant 14 : i32
    %69 = vector.broadcast %c14_i32 : i32 to vector<32x128xi32>
    %70 = arith.cmpi eq, %1, %69 : vector<32x128xi32>
    %c14 = arith.constant 14 : index
    %71 = memref.load %arg1[%c14] : memref<64xf32, #tpu.memory_space<smem>>
    %72 = vector.broadcast %71 : f32 to vector<32x128xf32>
    %73 = arith.select %70, %72, %68 : vector<32x128xi1>, vector<32x128xf32>
    %c15_i32 = arith.constant 15 : i32
    %74 = vector.broadcast %c15_i32 : i32 to vector<32x128xi32>
    %75 = arith.cmpi eq, %1, %74 : vector<32x128xi32>
    %c15 = arith.constant 15 : index
    %76 = memref.load %arg1[%c15] : memref<64xf32, #tpu.memory_space<smem>>
    %77 = vector.broadcast %76 : f32 to vector<32x128xf32>
    %78 = arith.select %75, %77, %73 : vector<32x128xi1>, vector<32x128xf32>
    %c16_i32 = arith.constant 16 : i32
    %79 = vector.broadcast %c16_i32 : i32 to vector<32x128xi32>
    %80 = arith.cmpi eq, %1, %79 : vector<32x128xi32>
    %c16 = arith.constant 16 : index
    %81 = memref.load %arg1[%c16] : memref<64xf32, #tpu.memory_space<smem>>
    %82 = vector.broadcast %81 : f32 to vector<32x128xf32>
    %83 = arith.select %80, %82, %78 : vector<32x128xi1>, vector<32x128xf32>
    %c17_i32 = arith.constant 17 : i32
    %84 = vector.broadcast %c17_i32 : i32 to vector<32x128xi32>
    %85 = arith.cmpi eq, %1, %84 : vector<32x128xi32>
    %c17 = arith.constant 17 : index
    %86 = memref.load %arg1[%c17] : memref<64xf32, #tpu.memory_space<smem>>
    %87 = vector.broadcast %86 : f32 to vector<32x128xf32>
    %88 = arith.select %85, %87, %83 : vector<32x128xi1>, vector<32x128xf32>
    %c18_i32 = arith.constant 18 : i32
    %89 = vector.broadcast %c18_i32 : i32 to vector<32x128xi32>
    %90 = arith.cmpi eq, %1, %89 : vector<32x128xi32>
    %c18 = arith.constant 18 : index
    %91 = memref.load %arg1[%c18] : memref<64xf32, #tpu.memory_space<smem>>
    %92 = vector.broadcast %91 : f32 to vector<32x128xf32>
    %93 = arith.select %90, %92, %88 : vector<32x128xi1>, vector<32x128xf32>
    %c19_i32 = arith.constant 19 : i32
    %94 = vector.broadcast %c19_i32 : i32 to vector<32x128xi32>
    %95 = arith.cmpi eq, %1, %94 : vector<32x128xi32>
    %c19 = arith.constant 19 : index
    %96 = memref.load %arg1[%c19] : memref<64xf32, #tpu.memory_space<smem>>
    %97 = vector.broadcast %96 : f32 to vector<32x128xf32>
    %98 = arith.select %95, %97, %93 : vector<32x128xi1>, vector<32x128xf32>
    %c20_i32 = arith.constant 20 : i32
    %99 = vector.broadcast %c20_i32 : i32 to vector<32x128xi32>
    %100 = arith.cmpi eq, %1, %99 : vector<32x128xi32>
    %c20 = arith.constant 20 : index
    %101 = memref.load %arg1[%c20] : memref<64xf32, #tpu.memory_space<smem>>
    %102 = vector.broadcast %101 : f32 to vector<32x128xf32>
    %103 = arith.select %100, %102, %98 : vector<32x128xi1>, vector<32x128xf32>
    %c21_i32 = arith.constant 21 : i32
    %104 = vector.broadcast %c21_i32 : i32 to vector<32x128xi32>
    %105 = arith.cmpi eq, %1, %104 : vector<32x128xi32>
    %c21 = arith.constant 21 : index
    %106 = memref.load %arg1[%c21] : memref<64xf32, #tpu.memory_space<smem>>
    %107 = vector.broadcast %106 : f32 to vector<32x128xf32>
    %108 = arith.select %105, %107, %103 : vector<32x128xi1>, vector<32x128xf32>
    %c22_i32 = arith.constant 22 : i32
    %109 = vector.broadcast %c22_i32 : i32 to vector<32x128xi32>
    %110 = arith.cmpi eq, %1, %109 : vector<32x128xi32>
    %c22 = arith.constant 22 : index
    %111 = memref.load %arg1[%c22] : memref<64xf32, #tpu.memory_space<smem>>
    %112 = vector.broadcast %111 : f32 to vector<32x128xf32>
    %113 = arith.select %110, %112, %108 : vector<32x128xi1>, vector<32x128xf32>
    %c23_i32 = arith.constant 23 : i32
    %114 = vector.broadcast %c23_i32 : i32 to vector<32x128xi32>
    %115 = arith.cmpi eq, %1, %114 : vector<32x128xi32>
    %c23 = arith.constant 23 : index
    %116 = memref.load %arg1[%c23] : memref<64xf32, #tpu.memory_space<smem>>
    %117 = vector.broadcast %116 : f32 to vector<32x128xf32>
    %118 = arith.select %115, %117, %113 : vector<32x128xi1>, vector<32x128xf32>
    %c24_i32 = arith.constant 24 : i32
    %119 = vector.broadcast %c24_i32 : i32 to vector<32x128xi32>
    %120 = arith.cmpi eq, %1, %119 : vector<32x128xi32>
    %c24 = arith.constant 24 : index
    %121 = memref.load %arg1[%c24] : memref<64xf32, #tpu.memory_space<smem>>
    %122 = vector.broadcast %121 : f32 to vector<32x128xf32>
    %123 = arith.select %120, %122, %118 : vector<32x128xi1>, vector<32x128xf32>
    %c25_i32 = arith.constant 25 : i32
    %124 = vector.broadcast %c25_i32 : i32 to vector<32x128xi32>
    %125 = arith.cmpi eq, %1, %124 : vector<32x128xi32>
    %c25 = arith.constant 25 : index
    %126 = memref.load %arg1[%c25] : memref<64xf32, #tpu.memory_space<smem>>
    %127 = vector.broadcast %126 : f32 to vector<32x128xf32>
    %128 = arith.select %125, %127, %123 : vector<32x128xi1>, vector<32x128xf32>
    %c26_i32 = arith.constant 26 : i32
    %129 = vector.broadcast %c26_i32 : i32 to vector<32x128xi32>
    %130 = arith.cmpi eq, %1, %129 : vector<32x128xi32>
    %c26 = arith.constant 26 : index
    %131 = memref.load %arg1[%c26] : memref<64xf32, #tpu.memory_space<smem>>
    %132 = vector.broadcast %131 : f32 to vector<32x128xf32>
    %133 = arith.select %130, %132, %128 : vector<32x128xi1>, vector<32x128xf32>
    %c27_i32 = arith.constant 27 : i32
    %134 = vector.broadcast %c27_i32 : i32 to vector<32x128xi32>
    %135 = arith.cmpi eq, %1, %134 : vector<32x128xi32>
    %c27 = arith.constant 27 : index
    %136 = memref.load %arg1[%c27] : memref<64xf32, #tpu.memory_space<smem>>
    %137 = vector.broadcast %136 : f32 to vector<32x128xf32>
    %138 = arith.select %135, %137, %133 : vector<32x128xi1>, vector<32x128xf32>
    %c28_i32 = arith.constant 28 : i32
    %139 = vector.broadcast %c28_i32 : i32 to vector<32x128xi32>
    %140 = arith.cmpi eq, %1, %139 : vector<32x128xi32>
    %c28 = arith.constant 28 : index
    %141 = memref.load %arg1[%c28] : memref<64xf32, #tpu.memory_space<smem>>
    %142 = vector.broadcast %141 : f32 to vector<32x128xf32>
    %143 = arith.select %140, %142, %138 : vector<32x128xi1>, vector<32x128xf32>
    %c29_i32 = arith.constant 29 : i32
    %144 = vector.broadcast %c29_i32 : i32 to vector<32x128xi32>
    %145 = arith.cmpi eq, %1, %144 : vector<32x128xi32>
    %c29 = arith.constant 29 : index
    %146 = memref.load %arg1[%c29] : memref<64xf32, #tpu.memory_space<smem>>
    %147 = vector.broadcast %146 : f32 to vector<32x128xf32>
    %148 = arith.select %145, %147, %143 : vector<32x128xi1>, vector<32x128xf32>
    %c30_i32 = arith.constant 30 : i32
    %149 = vector.broadcast %c30_i32 : i32 to vector<32x128xi32>
    %150 = arith.cmpi eq, %1, %149 : vector<32x128xi32>
    %c30 = arith.constant 30 : index
    %151 = memref.load %arg1[%c30] : memref<64xf32, #tpu.memory_space<smem>>
    %152 = vector.broadcast %151 : f32 to vector<32x128xf32>
    %153 = arith.select %150, %152, %148 : vector<32x128xi1>, vector<32x128xf32>
    %c31_i32 = arith.constant 31 : i32
    %154 = vector.broadcast %c31_i32 : i32 to vector<32x128xi32>
    %155 = arith.cmpi eq, %1, %154 : vector<32x128xi32>
    %c31 = arith.constant 31 : index
    %156 = memref.load %arg1[%c31] : memref<64xf32, #tpu.memory_space<smem>>
    %157 = vector.broadcast %156 : f32 to vector<32x128xf32>
    %158 = arith.select %155, %157, %153 : vector<32x128xi1>, vector<32x128xf32>
    %c32_i32 = arith.constant 32 : i32
    %159 = vector.broadcast %c32_i32 : i32 to vector<32x128xi32>
    %160 = arith.cmpi eq, %1, %159 : vector<32x128xi32>
    %c32 = arith.constant 32 : index
    %161 = memref.load %arg1[%c32] : memref<64xf32, #tpu.memory_space<smem>>
    %162 = vector.broadcast %161 : f32 to vector<32x128xf32>
    %163 = arith.select %160, %162, %158 : vector<32x128xi1>, vector<32x128xf32>
    %c33_i32 = arith.constant 33 : i32
    %164 = vector.broadcast %c33_i32 : i32 to vector<32x128xi32>
    %165 = arith.cmpi eq, %1, %164 : vector<32x128xi32>
    %c33 = arith.constant 33 : index
    %166 = memref.load %arg1[%c33] : memref<64xf32, #tpu.memory_space<smem>>
    %167 = vector.broadcast %166 : f32 to vector<32x128xf32>
    %168 = arith.select %165, %167, %163 : vector<32x128xi1>, vector<32x128xf32>
    %c34_i32 = arith.constant 34 : i32
    %169 = vector.broadcast %c34_i32 : i32 to vector<32x128xi32>
    %170 = arith.cmpi eq, %1, %169 : vector<32x128xi32>
    %c34 = arith.constant 34 : index
    %171 = memref.load %arg1[%c34] : memref<64xf32, #tpu.memory_space<smem>>
    %172 = vector.broadcast %171 : f32 to vector<32x128xf32>
    %173 = arith.select %170, %172, %168 : vector<32x128xi1>, vector<32x128xf32>
    %c35_i32 = arith.constant 35 : i32
    %174 = vector.broadcast %c35_i32 : i32 to vector<32x128xi32>
    %175 = arith.cmpi eq, %1, %174 : vector<32x128xi32>
    %c35 = arith.constant 35 : index
    %176 = memref.load %arg1[%c35] : memref<64xf32, #tpu.memory_space<smem>>
    %177 = vector.broadcast %176 : f32 to vector<32x128xf32>
    %178 = arith.select %175, %177, %173 : vector<32x128xi1>, vector<32x128xf32>
    %c36_i32 = arith.constant 36 : i32
    %179 = vector.broadcast %c36_i32 : i32 to vector<32x128xi32>
    %180 = arith.cmpi eq, %1, %179 : vector<32x128xi32>
    %c36 = arith.constant 36 : index
    %181 = memref.load %arg1[%c36] : memref<64xf32, #tpu.memory_space<smem>>
    %182 = vector.broadcast %181 : f32 to vector<32x128xf32>
    %183 = arith.select %180, %182, %178 : vector<32x128xi1>, vector<32x128xf32>
    %c37_i32 = arith.constant 37 : i32
    %184 = vector.broadcast %c37_i32 : i32 to vector<32x128xi32>
    %185 = arith.cmpi eq, %1, %184 : vector<32x128xi32>
    %c37 = arith.constant 37 : index
    %186 = memref.load %arg1[%c37] : memref<64xf32, #tpu.memory_space<smem>>
    %187 = vector.broadcast %186 : f32 to vector<32x128xf32>
    %188 = arith.select %185, %187, %183 : vector<32x128xi1>, vector<32x128xf32>
    %c38_i32 = arith.constant 38 : i32
    %189 = vector.broadcast %c38_i32 : i32 to vector<32x128xi32>
    %190 = arith.cmpi eq, %1, %189 : vector<32x128xi32>
    %c38 = arith.constant 38 : index
    %191 = memref.load %arg1[%c38] : memref<64xf32, #tpu.memory_space<smem>>
    %192 = vector.broadcast %191 : f32 to vector<32x128xf32>
    %193 = arith.select %190, %192, %188 : vector<32x128xi1>, vector<32x128xf32>
    %c39_i32 = arith.constant 39 : i32
    %194 = vector.broadcast %c39_i32 : i32 to vector<32x128xi32>
    %195 = arith.cmpi eq, %1, %194 : vector<32x128xi32>
    %c39 = arith.constant 39 : index
    %196 = memref.load %arg1[%c39] : memref<64xf32, #tpu.memory_space<smem>>
    %197 = vector.broadcast %196 : f32 to vector<32x128xf32>
    %198 = arith.select %195, %197, %193 : vector<32x128xi1>, vector<32x128xf32>
    %c40_i32 = arith.constant 40 : i32
    %199 = vector.broadcast %c40_i32 : i32 to vector<32x128xi32>
    %200 = arith.cmpi eq, %1, %199 : vector<32x128xi32>
    %c40 = arith.constant 40 : index
    %201 = memref.load %arg1[%c40] : memref<64xf32, #tpu.memory_space<smem>>
    %202 = vector.broadcast %201 : f32 to vector<32x128xf32>
    %203 = arith.select %200, %202, %198 : vector<32x128xi1>, vector<32x128xf32>
    %c41_i32 = arith.constant 41 : i32
    %204 = vector.broadcast %c41_i32 : i32 to vector<32x128xi32>
    %205 = arith.cmpi eq, %1, %204 : vector<32x128xi32>
    %c41 = arith.constant 41 : index
    %206 = memref.load %arg1[%c41] : memref<64xf32, #tpu.memory_space<smem>>
    %207 = vector.broadcast %206 : f32 to vector<32x128xf32>
    %208 = arith.select %205, %207, %203 : vector<32x128xi1>, vector<32x128xf32>
    %c42_i32 = arith.constant 42 : i32
    %209 = vector.broadcast %c42_i32 : i32 to vector<32x128xi32>
    %210 = arith.cmpi eq, %1, %209 : vector<32x128xi32>
    %c42 = arith.constant 42 : index
    %211 = memref.load %arg1[%c42] : memref<64xf32, #tpu.memory_space<smem>>
    %212 = vector.broadcast %211 : f32 to vector<32x128xf32>
    %213 = arith.select %210, %212, %208 : vector<32x128xi1>, vector<32x128xf32>
    %c43_i32 = arith.constant 43 : i32
    %214 = vector.broadcast %c43_i32 : i32 to vector<32x128xi32>
    %215 = arith.cmpi eq, %1, %214 : vector<32x128xi32>
    %c43 = arith.constant 43 : index
    %216 = memref.load %arg1[%c43] : memref<64xf32, #tpu.memory_space<smem>>
    %217 = vector.broadcast %216 : f32 to vector<32x128xf32>
    %218 = arith.select %215, %217, %213 : vector<32x128xi1>, vector<32x128xf32>
    %c44_i32 = arith.constant 44 : i32
    %219 = vector.broadcast %c44_i32 : i32 to vector<32x128xi32>
    %220 = arith.cmpi eq, %1, %219 : vector<32x128xi32>
    %c44 = arith.constant 44 : index
    %221 = memref.load %arg1[%c44] : memref<64xf32, #tpu.memory_space<smem>>
    %222 = vector.broadcast %221 : f32 to vector<32x128xf32>
    %223 = arith.select %220, %222, %218 : vector<32x128xi1>, vector<32x128xf32>
    %c45_i32 = arith.constant 45 : i32
    %224 = vector.broadcast %c45_i32 : i32 to vector<32x128xi32>
    %225 = arith.cmpi eq, %1, %224 : vector<32x128xi32>
    %c45 = arith.constant 45 : index
    %226 = memref.load %arg1[%c45] : memref<64xf32, #tpu.memory_space<smem>>
    %227 = vector.broadcast %226 : f32 to vector<32x128xf32>
    %228 = arith.select %225, %227, %223 : vector<32x128xi1>, vector<32x128xf32>
    %c46_i32 = arith.constant 46 : i32
    %229 = vector.broadcast %c46_i32 : i32 to vector<32x128xi32>
    %230 = arith.cmpi eq, %1, %229 : vector<32x128xi32>
    %c46 = arith.constant 46 : index
    %231 = memref.load %arg1[%c46] : memref<64xf32, #tpu.memory_space<smem>>
    %232 = vector.broadcast %231 : f32 to vector<32x128xf32>
    %233 = arith.select %230, %232, %228 : vector<32x128xi1>, vector<32x128xf32>
    %c47_i32 = arith.constant 47 : i32
    %234 = vector.broadcast %c47_i32 : i32 to vector<32x128xi32>
    %235 = arith.cmpi eq, %1, %234 : vector<32x128xi32>
    %c47 = arith.constant 47 : index
    %236 = memref.load %arg1[%c47] : memref<64xf32, #tpu.memory_space<smem>>
    %237 = vector.broadcast %236 : f32 to vector<32x128xf32>
    %238 = arith.select %235, %237, %233 : vector<32x128xi1>, vector<32x128xf32>
    %c48_i32 = arith.constant 48 : i32
    %239 = vector.broadcast %c48_i32 : i32 to vector<32x128xi32>
    %240 = arith.cmpi eq, %1, %239 : vector<32x128xi32>
    %c48 = arith.constant 48 : index
    %241 = memref.load %arg1[%c48] : memref<64xf32, #tpu.memory_space<smem>>
    %242 = vector.broadcast %241 : f32 to vector<32x128xf32>
    %243 = arith.select %240, %242, %238 : vector<32x128xi1>, vector<32x128xf32>
    %c49_i32 = arith.constant 49 : i32
    %244 = vector.broadcast %c49_i32 : i32 to vector<32x128xi32>
    %245 = arith.cmpi eq, %1, %244 : vector<32x128xi32>
    %c49 = arith.constant 49 : index
    %246 = memref.load %arg1[%c49] : memref<64xf32, #tpu.memory_space<smem>>
    %247 = vector.broadcast %246 : f32 to vector<32x128xf32>
    %248 = arith.select %245, %247, %243 : vector<32x128xi1>, vector<32x128xf32>
    %c50_i32 = arith.constant 50 : i32
    %249 = vector.broadcast %c50_i32 : i32 to vector<32x128xi32>
    %250 = arith.cmpi eq, %1, %249 : vector<32x128xi32>
    %c50 = arith.constant 50 : index
    %251 = memref.load %arg1[%c50] : memref<64xf32, #tpu.memory_space<smem>>
    %252 = vector.broadcast %251 : f32 to vector<32x128xf32>
    %253 = arith.select %250, %252, %248 : vector<32x128xi1>, vector<32x128xf32>
    %c51_i32 = arith.constant 51 : i32
    %254 = vector.broadcast %c51_i32 : i32 to vector<32x128xi32>
    %255 = arith.cmpi eq, %1, %254 : vector<32x128xi32>
    %c51 = arith.constant 51 : index
    %256 = memref.load %arg1[%c51] : memref<64xf32, #tpu.memory_space<smem>>
    %257 = vector.broadcast %256 : f32 to vector<32x128xf32>
    %258 = arith.select %255, %257, %253 : vector<32x128xi1>, vector<32x128xf32>
    %c52_i32 = arith.constant 52 : i32
    %259 = vector.broadcast %c52_i32 : i32 to vector<32x128xi32>
    %260 = arith.cmpi eq, %1, %259 : vector<32x128xi32>
    %c52 = arith.constant 52 : index
    %261 = memref.load %arg1[%c52] : memref<64xf32, #tpu.memory_space<smem>>
    %262 = vector.broadcast %261 : f32 to vector<32x128xf32>
    %263 = arith.select %260, %262, %258 : vector<32x128xi1>, vector<32x128xf32>
    %c53_i32 = arith.constant 53 : i32
    %264 = vector.broadcast %c53_i32 : i32 to vector<32x128xi32>
    %265 = arith.cmpi eq, %1, %264 : vector<32x128xi32>
    %c53 = arith.constant 53 : index
    %266 = memref.load %arg1[%c53] : memref<64xf32, #tpu.memory_space<smem>>
    %267 = vector.broadcast %266 : f32 to vector<32x128xf32>
    %268 = arith.select %265, %267, %263 : vector<32x128xi1>, vector<32x128xf32>
    %c54_i32 = arith.constant 54 : i32
    %269 = vector.broadcast %c54_i32 : i32 to vector<32x128xi32>
    %270 = arith.cmpi eq, %1, %269 : vector<32x128xi32>
    %c54 = arith.constant 54 : index
    %271 = memref.load %arg1[%c54] : memref<64xf32, #tpu.memory_space<smem>>
    %272 = vector.broadcast %271 : f32 to vector<32x128xf32>
    %273 = arith.select %270, %272, %268 : vector<32x128xi1>, vector<32x128xf32>
    %c55_i32 = arith.constant 55 : i32
    %274 = vector.broadcast %c55_i32 : i32 to vector<32x128xi32>
    %275 = arith.cmpi eq, %1, %274 : vector<32x128xi32>
    %c55 = arith.constant 55 : index
    %276 = memref.load %arg1[%c55] : memref<64xf32, #tpu.memory_space<smem>>
    %277 = vector.broadcast %276 : f32 to vector<32x128xf32>
    %278 = arith.select %275, %277, %273 : vector<32x128xi1>, vector<32x128xf32>
    %c56_i32 = arith.constant 56 : i32
    %279 = vector.broadcast %c56_i32 : i32 to vector<32x128xi32>
    %280 = arith.cmpi eq, %1, %279 : vector<32x128xi32>
    %c56 = arith.constant 56 : index
    %281 = memref.load %arg1[%c56] : memref<64xf32, #tpu.memory_space<smem>>
    %282 = vector.broadcast %281 : f32 to vector<32x128xf32>
    %283 = arith.select %280, %282, %278 : vector<32x128xi1>, vector<32x128xf32>
    %c57_i32 = arith.constant 57 : i32
    %284 = vector.broadcast %c57_i32 : i32 to vector<32x128xi32>
    %285 = arith.cmpi eq, %1, %284 : vector<32x128xi32>
    %c57 = arith.constant 57 : index
    %286 = memref.load %arg1[%c57] : memref<64xf32, #tpu.memory_space<smem>>
    %287 = vector.broadcast %286 : f32 to vector<32x128xf32>
    %288 = arith.select %285, %287, %283 : vector<32x128xi1>, vector<32x128xf32>
    %c58_i32 = arith.constant 58 : i32
    %289 = vector.broadcast %c58_i32 : i32 to vector<32x128xi32>
    %290 = arith.cmpi eq, %1, %289 : vector<32x128xi32>
    %c58 = arith.constant 58 : index
    %291 = memref.load %arg1[%c58] : memref<64xf32, #tpu.memory_space<smem>>
    %292 = vector.broadcast %291 : f32 to vector<32x128xf32>
    %293 = arith.select %290, %292, %288 : vector<32x128xi1>, vector<32x128xf32>
    %c59_i32 = arith.constant 59 : i32
    %294 = vector.broadcast %c59_i32 : i32 to vector<32x128xi32>
    %295 = arith.cmpi eq, %1, %294 : vector<32x128xi32>
    %c59 = arith.constant 59 : index
    %296 = memref.load %arg1[%c59] : memref<64xf32, #tpu.memory_space<smem>>
    %297 = vector.broadcast %296 : f32 to vector<32x128xf32>
    %298 = arith.select %295, %297, %293 : vector<32x128xi1>, vector<32x128xf32>
    %c60_i32 = arith.constant 60 : i32
    %299 = vector.broadcast %c60_i32 : i32 to vector<32x128xi32>
    %300 = arith.cmpi eq, %1, %299 : vector<32x128xi32>
    %c60 = arith.constant 60 : index
    %301 = memref.load %arg1[%c60] : memref<64xf32, #tpu.memory_space<smem>>
    %302 = vector.broadcast %301 : f32 to vector<32x128xf32>
    %303 = arith.select %300, %302, %298 : vector<32x128xi1>, vector<32x128xf32>
    %c61_i32 = arith.constant 61 : i32
    %304 = vector.broadcast %c61_i32 : i32 to vector<32x128xi32>
    %305 = arith.cmpi eq, %1, %304 : vector<32x128xi32>
    %c61 = arith.constant 61 : index
    %306 = memref.load %arg1[%c61] : memref<64xf32, #tpu.memory_space<smem>>
    %307 = vector.broadcast %306 : f32 to vector<32x128xf32>
    %308 = arith.select %305, %307, %303 : vector<32x128xi1>, vector<32x128xf32>
    %c62_i32 = arith.constant 62 : i32
    %309 = vector.broadcast %c62_i32 : i32 to vector<32x128xi32>
    %310 = arith.cmpi eq, %1, %309 : vector<32x128xi32>
    %c62 = arith.constant 62 : index
    %311 = memref.load %arg1[%c62] : memref<64xf32, #tpu.memory_space<smem>>
    %312 = vector.broadcast %311 : f32 to vector<32x128xf32>
    %313 = arith.select %310, %312, %308 : vector<32x128xi1>, vector<32x128xf32>
    %c63_i32 = arith.constant 63 : i32
    %314 = vector.broadcast %c63_i32 : i32 to vector<32x128xi32>
    %315 = arith.cmpi eq, %1, %314 : vector<32x128xi32>
    %c63 = arith.constant 63 : index
    %316 = memref.load %arg1[%c63] : memref<64xf32, #tpu.memory_space<smem>>
    %317 = vector.broadcast %316 : f32 to vector<32x128xf32>
    %318 = arith.select %315, %317, %313 : vector<32x128xi1>, vector<32x128xf32>
    %c0_2 = arith.constant 0 : index
    %c0_3 = arith.constant 0 : index
    %319 = vector.load %arg3[%c0_2, %c0_3] : memref<32x128xi8, #tpu.memory_space<vmem>>, vector<32x128xi8>
    %320 = arith.sitofp %319 : vector<32x128xi8> to vector<32x128xf32>
    %c0_4 = arith.constant 0 : index
    %c0_5 = arith.constant 0 : index
    %321 = vector.load %arg4[%c0_4, %c0_5] : memref<1x128xf32, #tpu.memory_space<vmem>>, vector<1x128xf32>
    %322 = vector.broadcast %321 : vector<1x128xf32> to vector<32x128xf32>
    %323 = arith.addf %318, %322 : vector<32x128xf32>
    %324 = arith.mulf %323, %320 : vector<32x128xf32>
    %325 = math.exp %324 : vector<32x128xf32>
    %c0_6 = arith.constant 0 : index
    %c0_7 = arith.constant 0 : index
    %326 = vector.load %arg5[%c0_6, %c0_7] : memref<32x128xf32, #tpu.memory_space<vmem>>, vector<32x128xf32>
    tpu.vector_store %arg5[%c0_6, %c0_7], %325 {strides = array<i32>} : memref<32x128xf32, #tpu.memory_space<vmem>>, vector<32x128xf32>,
    return
  }
  func.func @transform_0(%arg0: i32) -> i32 {
    %c0_i32 = arith.constant 0 : i32
    %c0_i32_0 = arith.constant 0 : i32
    return %c0_i32 : i32
  }
  func.func @transform_1(%arg0: i32) -> (i32, i32) {
    %c0_i32 = arith.constant 0 : i32
    %c0_i32_0 = arith.constant 0 : i32
    return %arg0, %c0_i32 : i32, i32
  }
  func.func @transform_2(%arg0: i32) -> (i32, i32) {
    %c0_i32 = arith.constant 0 : i32
    %c0_i32_0 = arith.constant 0 : i32
    return %arg0, %c0_i32 : i32, i32
  }
  func.func @transform_3(%arg0: i32) -> (i32, i32) {
    %c0_i32 = arith.constant 0 : i32
    %c0_i32_0 = arith.constant 0 : i32
    %c0_i32_1 = arith.constant 0 : i32
    return %c0_i32, %c0_i32_0 : i32, i32
  }
  func.func @transform_4(%arg0: i32) -> (i32, i32) {
    %c0_i32 = arith.constant 0 : i32
    %c0_i32_0 = arith.constant 0 : i32
    return %arg0, %c0_i32 : i32, i32
  }
}

</mosaic_0001>

<bundles_post_ra>
// kernel: tpu_custom_call.1
= control target key start
LH: loop header
LB: loop body
LE: loop exit
PB: predicated region body
PF: predicated region fallthrough
CT: control target
= control target key end

     0   :  { %9 = vsyncpa [#allocation5], 0  ;;  %s1479_s0 = inlined_call_operand.hbm [shape: f32[64], index: 0, kind: input, shape index: {}]   ;;  %s1480_s1 = inlined_call_operand.hbm [shape: s16[32,128], index: 1, kind: input, shape index: {}]   ;;  %s1481_s2 = inlined_call_operand.hbm [shape: s8[32,128], index: 2, kind: input, shape index: {}]   ;;  %s1482_s3 = inlined_call_operand.vmem [shape: f32[1,128], index: 3, kind: input, shape index: {}]   ;;  %s1483_s4 = inlined_call_operand.hbm [shape: f32[32,128], index: 4, kind: output, shape index: {}]  }
   0x1   :  { %10 = vsyncpa [#allocation3], 0 }
   0x2   :  { %11 = vsyncpa [#allocation8], 0 }
   0x3   :  { %12 = vsyncpa [#allocation4], 0  ;;  %s839_s17 = scalar_lea.hbm %s1479_s0, 16 }
   0x4   :  { %p840_p0 = scmp.ne.s32.totalorder %s1479_s0, %s839_s17  ;;  %p843_p1 = scmp.lt.u32.totalorder %s839_s17, %s1479_s0 }
   0x6   :  { %p845_p2 = pnand %p843_p1, %p840_p0 }
   0x8   :  { %848 = shalt.err (!%p845_p2)
}
   0x9   :  { %s923_s22 = smov [#allocation2]   ;;  %s924_s25 = smov [#allocation6]  }
   0xa   :  { %20 = dma.hbm_to_smem %s1479_s0, 16, %s923_s22, [#allocation5]  }
   0xb   :  { %s26_s26 = sshll.u32 %s924_s25, 4  ;;  %s849_s29 = scalar_lea.hbm %s1480_s1, 256  ;;  %s27_s26 = int_to_ptr.vmem [resolvable:$true] %s26_s26 }
   0xc   :  { %p850_p3 = scmp.ne.s32.totalorder %s1480_s1, %s849_s29  ;;  %p853_p4 = scmp.lt.u32.totalorder %s849_s29, %s1480_s1 }
   0xe   :  { %p855_p5 = pnand %p853_p4, %p850_p3 }
  0x10   :  { %858 = shalt.err (!%p855_p5)
}
  0x11   :  { %s859_s8 = scalar_lea.vmem %s27_s26, 256  ;;  %p864_p7 = scmp.lt.s32.totalorder %s27_s26, %s27_s26 }
  0x12   :  { %p860_p6 = scmp.ne.s32.totalorder %s27_s26, %s859_s8  ;;  %p865_p8 = scmp.lt.s32.totalorder %s859_s8, %s859_s8 }
  0x14   :  { %p866_p9 = por %p865_p8, %p864_p7 }
  0x16   :  { %p867_p10 = pnand %p866_p9, %p860_p6 }
  0x18   :  { %870 = shalt.err (!%p867_p10)
}
  0x19   :  { %s925_s0 = smov 64   ;;  %s926_s9 = smov 4  }
  0x1a   :  { %32 = dma.hbm_to_vmem [thread:$0]  %s1480_s1, 256, %s27_s26, [#allocation3], %s925_s0, %s925_s0, %s926_s9  }
  0x1b   :  { %s927_s12 = smov [#allocation7]   ;;  %s871_s16 = scalar_lea.hbm %s1481_s2, 128 }
  0x1c   :  { %s39_s13 = sshll.u32 %s927_s12, 4  ;;  %p872_p11 = scmp.ne.s32.totalorder %s1481_s2, %s871_s16  ;;  %s40_s13 = int_to_ptr.vmem [resolvable:$true] %s39_s13 }
  0x1d   :  { %p875_p12 = scmp.lt.u32.totalorder %s871_s16, %s1481_s2 }
  0x1f   :  { %p877_p13 = pnand %p875_p12, %p872_p11 }
  0x21   :  { %880 = shalt.err (!%p877_p13)
}
  0x22   :  { %s881_s21 = scalar_lea.vmem %s40_s13, 128  ;;  %p886_p1 = scmp.lt.s32.totalorder %s40_s13, %s40_s13 }
  0x23   :  { %p882_p0 = scmp.ne.s32.totalorder %s40_s13, %s881_s21  ;;  %p887_p2 = scmp.lt.s32.totalorder %s881_s21, %s881_s21 }
  0x25   :  { %p888_p3 = por %p887_p2, %p886_p1 }
  0x27   :  { %p889_p4 = pnand %p888_p3, %p882_p0 }
  0x29   :  { %892 = shalt.err (!%p889_p4)
}
  0x2a   :  { %42 = dma.hbm_to_vmem [thread:$0]  %s1481_s2, 128, %s40_s13, [#allocation8]  }
  0x2b   :  { %915 = dma.done.wait [#allocation5], 16  }
  0x2c   :  { %916 = vsyncadd [#allocation5], 4294967280 }
  0x2d   :  { %917 = dma.done.wait [#allocation3], 256  }
  0x2e   :  { %918 = vsyncadd [#allocation3], 4294967040 }
  0x2f   :  { %919 = dma.done.wait [#allocation8], 128  }
  0x30   :  { %920 = vsyncadd [#allocation8], 4294967168 }
  0x31   :  { %54 = sfence }
  0x32   :  { %v815_v0 = vld [vmem:[#allocation6] sm:$0xff]   ;;  %v822_v1 = vld [vmem:[#allocation6 + $0x8] sm:$0xff]   ;;  %s63_s23 = sld [smem:[#allocation2]]  ;;  %s750_s24 = sld [smem:[#allocation2 + $0x1]] }
  0x33   :  { %v992_v2 = vunpack.c.l.b16 %v815_v0  ;;  %v994_v3 = vunpack.c.h.b16 %v815_v0  ;;  %v996_v4 = vunpack.c.l.b16 %v822_v1  ;;  %v998_v5 = vunpack.c.h.b16 %v822_v1  ;;  %s751_s2 = sld [smem:[#allocation2 + $0x2]]  ;;  %s752_s25 = sld [smem:[#allocation2 + $0x3]] }
  0x34   :  { %s1004_s26 = sld [smem:[#allocation2 + $0x4]]  ;;  %s1014_s27 = sld [smem:[#allocation2 + $0x5]] }
  0x35   :  { %vm65_vm0 = vcmp.eq.s32.totalorder %v992_v2, 1  ;;  %vm66_vm1 = vcmp.eq.s32.totalorder %v994_v3, 1  ;;  %vm67_vm2 = vcmp.eq.s32.totalorder %v996_v4, 1  ;;  %vm68_vm3 = vcmp.eq.s32.totalorder %v998_v5, 1  ;;  %s1026_s28 = sld [smem:[#allocation2 + $0x6]]  ;;  %s1038_s29 = sld [smem:[#allocation2 + $0x7]] }
  0x36   :  { %vm75_vm4 = vcmp.eq.s32.totalorder %v992_v2, 2  ;;  %vm76_vm5 = vcmp.eq.s32.totalorder %v994_v3, 2  ;;  %vm77_vm6 = vcmp.eq.s32.totalorder %v996_v4, 2  ;;  %vm78_vm7 = vcmp.eq.s32.totalorder %v998_v5, 2  ;;  %s1060_s30 = sld [smem:[#allocation2 + $0x8]]  ;;  %s1066_s5 = sld [smem:[#allocation2 + $0x9]] }
  0x37   :  { %vm85_vm8 = vcmp.eq.s32.totalorder %v992_v2, 3  ;;  %vm86_vm9 = vcmp.eq.s32.totalorder %v994_v3, 3  ;;  %vm87_vm10 = vcmp.eq.s32.totalorder %v996_v4, 3  ;;  %vm88_vm11 = vcmp.eq.s32.totalorder %v998_v5, 3  ;;  %s1072_s6 = sld [smem:[#allocation2 + $0xa]]  ;;  %s1078_s7 = sld [smem:[#allocation2 + $0xb]] }
  0x38   :  { %v64_v6 = vstv %s63_s23  ;;  %v70_v7 = vstv %s750_s24  ;;  %vm95_vm12 = vcmp.eq.s32.totalorder %v992_v2, 4  ;;  %vm96_vm13 = vcmp.eq.s32.totalorder %v994_v3, 4  ;;  %s1088_s8 = sld [smem:[#allocation2 + $0xc]]  ;;  %s1094_s0 = sld [smem:[#allocation2 + $0xd]] }
  0x39   :  { %v71_v8 = vsel %vm65_vm0, %v70_v7, %v64_v6  ;;  %v72_v9 = vsel %vm66_vm1, %v70_v7, %v64_v6  ;;  %v73_v10 = vsel %vm67_vm2, %v70_v7, %v64_v6  ;;  %v74_v11 = vsel %vm68_vm3, %v70_v7, %v64_v6  ;;  %s1100_s9 = sld [smem:[#allocation2 + $0xe]]  ;;  %s1106_s10 = sld [smem:[#allocation2 + $0xf]] }
  0x3a   :  { %v80_v12 = vstv %s751_s2  ;;  %v90_v13 = vstv %s752_s25  ;;  %vm97_vm14 = vcmp.eq.s32.totalorder %v996_v4, 4  ;;  %vm98_vm15 = vcmp.eq.s32.totalorder %v998_v5, 4  ;;  %s1116_s11 = sld [smem:[#allocation2 + $0x10]]  ;;  %s1122_s12 = sld [smem:[#allocation2 + $0x11]] }
  0x3b   :  { %v81_v14 = vsel %vm75_vm4, %v80_v12, %v71_v8  ;;  %v82_v15 = vsel %vm76_vm5, %v80_v12, %v72_v9  ;;  %v83_v16 = vsel %vm77_vm6, %v80_v12, %v73_v10  ;;  %v84_v17 = vsel %vm78_vm7, %v80_v12, %v74_v11  ;;  %s1128_s13 = sld [smem:[#allocation2 + $0x12]]  ;;  %s1134_s14 = sld [smem:[#allocation2 + $0x13]] }
  0x3c   :  { %v91_v18 = vsel %vm85_vm8, %v90_v13, %v81_v14  ;;  %v92_v19 = vsel %vm86_vm9, %v90_v13, %v82_v15  ;;  %v93_v20 = vsel %vm87_vm10, %v90_v13, %v83_v16  ;;  %v94_v21 = vsel %vm88_vm11, %v90_v13, %v84_v17  ;;  %s1144_s15 = sld [smem:[#allocation2 + $0x14]]  ;;  %s1150_s16 = sld [smem:[#allocation2 + $0x15]] }
  0x3d   :  { %v100_v22 = vstv %s1004_s26  ;;  %vm105_vm0 = vcmp.eq.s32.totalorder %v992_v2, 5  ;;  %vm106_vm1 = vcmp.eq.s32.totalorder %v994_v3, 5  ;;  %vm107_vm2 = vcmp.eq.s32.totalorder %v996_v4, 5  ;;  %s1156_s17 = sld [smem:[#allocation2 + $0x16]]  ;;  %s1162_s18 = sld [smem:[#allocation2 + $0x17]] }
  0x3e   :  { %v101_v23 = vsel %vm95_vm12, %v100_v22, %v91_v18  ;;  %v102_v24 = vsel %vm96_vm13, %v100_v22, %v92_v19  ;;  %v103_v25 = vsel %vm97_vm14, %v100_v22, %v93_v20  ;;  %v104_v26 = vsel %vm98_vm15, %v100_v22, %v94_v21  ;;  %s1172_s19 = sld [smem:[#allocation2 + $0x18]]  ;;  %s1178_s20 = sld [smem:[#allocation2 + $0x19]] }
  0x3f   :  { %vm108_vm3 = vcmp.eq.s32.totalorder %v998_v5, 5  ;;  %v110_v27 = vstv %s1014_s27  ;;  %vm115_vm4 = vcmp.eq.s32.totalorder %v992_v2, 6  ;;  %vm116_vm5 = vcmp.eq.s32.totalorder %v994_v3, 6  ;;  %s1184_s21 = sld [smem:[#allocation2 + $0x1a]]  ;;  %s1190_s1 = sld [smem:[#allocation2 + $0x1b]] }
  0x40   :  { %v111_v28 = vsel %vm105_vm0, %v110_v27, %v101_v23  ;;  %v112_v29 = vsel %vm106_vm1, %v110_v27, %v102_v24  ;;  %v113_v30 = vsel %vm107_vm2, %v110_v27, %v103_v25  ;;  %v114_v31 = vsel %vm108_vm3, %v110_v27, %v104_v26  ;;  %s1200_s22 = sld [smem:[#allocation2 + $0x1c]]  ;;  %s1206_s23 = sld [smem:[#allocation2 + $0x1d]] }
  0x41   :  { %vm117_vm6 = vcmp.eq.s32.totalorder %v996_v4, 6  ;;  %vm118_vm7 = vcmp.eq.s32.totalorder %v998_v5, 6  ;;  %v120_v32 = vstv %s1026_s28  ;;  %vm125_vm8 = vcmp.eq.s32.totalorder %v992_v2, 7  ;;  %s1212_s24 = sld [smem:[#allocation2 + $0x1e]]  ;;  %s1218_s2 = sld [smem:[#allocation2 + $0x1f]] }
  0x42   :  { %v121_v33 = vsel %vm115_vm4, %v120_v32, %v111_v28  ;;  %v122_v34 = vsel %vm116_vm5, %v120_v32, %v112_v29  ;;  %v123_v35 = vsel %vm117_vm6, %v120_v32, %v113_v30  ;;  %v124_v36 = vsel %vm118_vm7, %v120_v32, %v114_v31  ;;  %s1228_s25 = sld [smem:[#allocation2 + $0x20]]  ;;  %s1234_s26 = sld [smem:[#allocation2 + $0x21]] }
  0x43   :  { %vm126_vm9 = vcmp.eq.s32.totalorder %v994_v3, 7  ;;  %vm127_vm10 = vcmp.eq.s32.totalorder %v996_v4, 7  ;;  %vm128_vm11 = vcmp.eq.s32.totalorder %v998_v5, 7  ;;  %v130_v37 = vstv %s1038_s29  ;;  %s1240_s27 = sld [smem:[#allocation2 + $0x22]]  ;;  %s1246_s28 = sld [smem:[#allocation2 + $0x23]] }
  0x44   :  { %v131_v38 = vsel %vm125_vm8, %v130_v37, %v121_v33  ;;  %v132_v39 = vsel %vm126_vm9, %v130_v37, %v122_v34  ;;  %v133_v40 = vsel %vm127_vm10, %v130_v37, %v123_v35  ;;  %v134_v41 = vsel %vm128_vm11, %v130_v37, %v124_v36  ;;  %s1256_s29 = sld [smem:[#allocation2 + $0x24]] }
  0x45   :  { %vm135_vm12 = vcmp.eq.s32.totalorder %v992_v2, 8  ;;  %vm136_vm13 = vcmp.eq.s32.totalorder %v994_v3, 8  ;;  %vm137_vm14 = vcmp.eq.s32.totalorder %v996_v4, 8  ;;  %vm138_vm15 = vcmp.eq.s32.totalorder %v998_v5, 8 }
  0x46   :  { %v140_v42 = vstv %s1060_s30  ;;  %vm145_vm0 = vcmp.eq.s32.totalorder %v992_v2, 9  ;;  %vm146_vm1 = vcmp.eq.s32.totalorder %v994_v3, 9  ;;  %vm147_vm2 = vcmp.eq.s32.totalorder %v996_v4, 9  ;;  %s1262_s30 = sld [smem:[#allocation2 + $0x25]] }
  0x47   :  { %v141_v43 = vsel %vm135_vm12, %v140_v42, %v131_v38  ;;  %v142_v44 = vsel %vm136_vm13, %v140_v42, %v132_v39  ;;  %v143_v45 = vsel %vm137_vm14, %v140_v42, %v133_v40  ;;  %v144_v46 = vsel %vm138_vm15, %v140_v42, %v134_v41 }
  0x48   :  { %vm148_vm3 = vcmp.eq.s32.totalorder %v998_v5, 9  ;;  %v150_v47 = vstv %s1066_s5  ;;  %vm155_vm4 = vcmp.eq.s32.totalorder %v992_v2, 10  ;;  %vm156_vm5 = vcmp.eq.s32.totalorder %v994_v3, 10  ;;  %s1268_s5 = sld [smem:[#allocation2 + $0x26]] }
  0x49   :  { %v151_v48 = vsel %vm145_vm0, %v150_v47, %v141_v43  ;;  %v152_v49 = vsel %vm146_vm1, %v150_v47, %v142_v44  ;;  %v153_v50 = vsel %vm147_vm2, %v150_v47, %v143_v45  ;;  %v154_v51 = vsel %vm148_vm3, %v150_v47, %v144_v46 }
  0x4a   :  { %vm157_vm6 = vcmp.eq.s32.totalorder %v996_v4, 10  ;;  %vm158_vm7 = vcmp.eq.s32.totalorder %v998_v5, 10  ;;  %v160_v52 = vstv %s1072_s6  ;;  %vm165_vm8 = vcmp.eq.s32.totalorder %v992_v2, 11  ;;  %s1274_s6 = sld [smem:[#allocation2 + $0x27]] }
  0x4b   :  { %v161_v53 = vsel %vm155_vm4, %v160_v52, %v151_v48  ;;  %v162_v54 = vsel %vm156_vm5, %v160_v52, %v152_v49  ;;  %v163_v55 = vsel %vm157_vm6, %v160_v52, %v153_v50  ;;  %v164_v56 = vsel %vm158_vm7, %v160_v52, %v154_v51 }
  0x4c   :  { %vm166_vm9 = vcmp.eq.s32.totalorder %v994_v3, 11  ;;  %vm167_vm10 = vcmp.eq.s32.totalorder %v996_v4, 11  ;;  %vm168_vm11 = vcmp.eq.s32.totalorder %v998_v5, 11  ;;  %v170_v57 = vstv %s1078_s7  ;;  %s1284_s7 = sld [smem:[#allocation2 + $0x28]] }
  0x4d   :  { %v171_v58 = vsel %vm165_vm8, %v170_v57, %v161_v53  ;;  %v172_v59 = vsel %vm166_vm9, %v170_v57, %v162_v54  ;;  %v173_v60 = vsel %vm167_vm10, %v170_v57, %v163_v55  ;;  %v174_v61 = vsel %vm168_vm11, %v170_v57, %v164_v56 }
  0x4e   :  { %vm175_vm12 = vcmp.eq.s32.totalorder %v992_v2, 12  ;;  %vm176_vm13 = vcmp.eq.s32.totalorder %v994_v3, 12  ;;  %vm177_vm14 = vcmp.eq.s32.totalorder %v996_v4, 12  ;;  %vm178_vm15 = vcmp.eq.s32.totalorder %v998_v5, 12 }
  0x4f   :  { %v180_v62 = vstv %s1088_s8  ;;  %vm185_vm0 = vcmp.eq.s32.totalorder %v992_v2, 13  ;;  %vm186_vm1 = vcmp.eq.s32.totalorder %v994_v3, 13  ;;  %vm187_vm2 = vcmp.eq.s32.totalorder %v996_v4, 13  ;;  %s1290_s8 = sld [smem:[#allocation2 + $0x29]] }
  0x50   :  { %v181_v63 = vsel %vm175_vm12, %v180_v62, %v171_v58  ;;  %v182_v0 = vsel %vm176_vm13, %v180_v62, %v172_v59  ;;  %v183_v1 = vsel %vm177_vm14, %v180_v62, %v173_v60  ;;  %v184_v6 = vsel %vm178_vm15, %v180_v62, %v174_v61 }
  0x51   :  { %vm188_vm3 = vcmp.eq.s32.totalorder %v998_v5, 13  ;;  %v190_v7 = vstv %s1094_s0  ;;  %vm195_vm4 = vcmp.eq.s32.totalorder %v992_v2, 14  ;;  %vm196_vm5 = vcmp.eq.s32.totalorder %v994_v3, 14  ;;  %s1296_s0 = sld [smem:[#allocation2 + $0x2a]] }
  0x52   :  { %v191_v8 = vsel %vm185_vm0, %v190_v7, %v181_v63  ;;  %v192_v9 = vsel %vm186_vm1, %v190_v7, %v182_v0  ;;  %v193_v10 = vsel %vm187_vm2, %v190_v7, %v183_v1  ;;  %v194_v11 = vsel %vm188_vm3, %v190_v7, %v184_v6 }
  0x53   :  { %vm197_vm6 = vcmp.eq.s32.totalorder %v996_v4, 14  ;;  %vm198_vm7 = vcmp.eq.s32.totalorder %v998_v5, 14  ;;  %v200_v12 = vstv %s1100_s9  ;;  %vm205_vm8 = vcmp.eq.s32.totalorder %v992_v2, 15  ;;  %s1302_s9 = sld [smem:[#allocation2 + $0x2b]] }
  0x54   :  { %v201_v13 = vsel %vm195_vm4, %v200_v12, %v191_v8  ;;  %v202_v14 = vsel %vm196_vm5, %v200_v12, %v192_v9  ;;  %v203_v15 = vsel %vm197_vm6, %v200_v12, %v193_v10  ;;  %v204_v16 = vsel %vm198_vm7, %v200_v12, %v194_v11 }
  0x55   :  { %vm206_vm9 = vcmp.eq.s32.totalorder %v994_v3, 15  ;;  %vm207_vm10 = vcmp.eq.s32.totalorder %v996_v4, 15  ;;  %vm208_vm11 = vcmp.eq.s32.totalorder %v998_v5, 15  ;;  %v210_v17 = vstv %s1106_s10  ;;  %s1312_s10 = sld [smem:[#allocation2 + $0x2c]] }
  0x56   :  { %v211_v18 = vsel %vm205_vm8, %v210_v17, %v201_v13  ;;  %v212_v19 = vsel %vm206_vm9, %v210_v17, %v202_v14  ;;  %v213_v20 = vsel %vm207_vm10, %v210_v17, %v203_v15  ;;  %v214_v21 = vsel %vm208_vm11, %v210_v17, %v204_v16 }
  0x57   :  { %vm215_vm12 = vcmp.eq.s32.totalorder %v992_v2, 16  ;;  %vm216_vm13 = vcmp.eq.s32.totalorder %v994_v3, 16  ;;  %vm217_vm14 = vcmp.eq.s32.totalorder %v996_v4, 16  ;;  %vm218_vm15 = vcmp.eq.s32.totalorder %v998_v5, 16 }
  0x58   :  { %v220_v22 = vstv %s1116_s11  ;;  %vm225_vm0 = vcmp.eq.s32.totalorder %v992_v2, 17  ;;  %vm226_vm1 = vcmp.eq.s32.totalorder %v994_v3, 17  ;;  %vm227_vm2 = vcmp.eq.s32.totalorder %v996_v4, 17  ;;  %s1318_s11 = sld [smem:[#allocation2 + $0x2d]] }
  0x59   :  { %v221_v23 = vsel %vm215_vm12, %v220_v22, %v211_v18  ;;  %v222_v24 = vsel %vm216_vm13, %v220_v22, %v212_v19  ;;  %v223_v25 = vsel %vm217_vm14, %v220_v22, %v213_v20  ;;  %v224_v26 = vsel %vm218_vm15, %v220_v22, %v214_v21 }
  0x5a   :  { %vm228_vm3 = vcmp.eq.s32.totalorder %v998_v5, 17  ;;  %v230_v27 = vstv %s1122_s12  ;;  %vm235_vm4 = vcmp.eq.s32.totalorder %v992_v2, 18  ;;  %vm236_vm5 = vcmp.eq.s32.totalorder %v994_v3, 18  ;;  %s1324_s12 = sld [smem:[#allocation2 + $0x2e]] }
  0x5b   :  { %v231_v28 = vsel %vm225_vm0, %v230_v27, %v221_v23  ;;  %v232_v29 = vsel %vm226_vm1, %v230_v27, %v222_v24  ;;  %v233_v30 = vsel %vm227_vm2, %v230_v27, %v223_v25  ;;  %v234_v31 = vsel %vm228_vm3, %v230_v27, %v224_v26 }
  0x5c   :  { %vm237_vm6 = vcmp.eq.s32.totalorder %v996_v4, 18  ;;  %vm238_vm7 = vcmp.eq.s32.totalorder %v998_v5, 18  ;;  %v240_v32 = vstv %s1128_s13  ;;  %vm245_vm8 = vcmp.eq.s32.totalorder %v992_v2, 19  ;;  %s1330_s13 = sld [smem:[#allocation2 + $0x2f]] }
  0x5d   :  { %v241_v33 = vsel %vm235_vm4, %v240_v32, %v231_v28  ;;  %v242_v34 = vsel %vm236_vm5, %v240_v32, %v232_v29  ;;  %v243_v35 = vsel %vm237_vm6, %v240_v32, %v233_v30  ;;  %v244_v36 = vsel %vm238_vm7, %v240_v32, %v234_v31 }
  0x5e   :  { %vm246_vm9 = vcmp.eq.s32.totalorder %v994_v3, 19  ;;  %vm247_vm10 = vcmp.eq.s32.totalorder %v996_v4, 19  ;;  %vm248_vm11 = vcmp.eq.s32.totalorder %v998_v5, 19  ;;  %v250_v37 = vstv %s1134_s14  ;;  %s1340_s14 = sld [smem:[#allocation2 + $0x30]] }
  0x5f   :  { %v251_v38 = vsel %vm245_vm8, %v250_v37, %v241_v33  ;;  %v252_v39 = vsel %vm246_vm9, %v250_v37, %v242_v34  ;;  %v253_v40 = vsel %vm247_vm10, %v250_v37, %v243_v35  ;;  %v254_v41 = vsel %vm248_vm11, %v250_v37, %v244_v36 }
  0x60   :  { %vm255_vm12 = vcmp.eq.s32.totalorder %v992_v2, 20  ;;  %vm256_vm13 = vcmp.eq.s32.totalorder %v994_v3, 20  ;;  %vm257_vm14 = vcmp.eq.s32.totalorder %v996_v4, 20  ;;  %vm258_vm15 = vcmp.eq.s32.totalorder %v998_v5, 20 }
  0x61   :  { %v260_v42 = vstv %s1144_s15  ;;  %vm265_vm0 = vcmp.eq.s32.totalorder %v992_v2, 21  ;;  %vm266_vm1 = vcmp.eq.s32.totalorder %v994_v3, 21  ;;  %vm267_vm2 = vcmp.eq.s32.totalorder %v996_v4, 21  ;;  %s1346_s15 = sld [smem:[#allocation2 + $0x31]] }
  0x62   :  { %v261_v43 = vsel %vm255_vm12, %v260_v42, %v251_v38  ;;  %v262_v44 = vsel %vm256_vm13, %v260_v42, %v252_v39  ;;  %v263_v45 = vsel %vm257_vm14, %v260_v42, %v253_v40  ;;  %v264_v46 = vsel %vm258_vm15, %v260_v42, %v254_v41 }
  0x63   :  { %vm268_vm3 = vcmp.eq.s32.totalorder %v998_v5, 21  ;;  %v270_v47 = vstv %s1150_s16  ;;  %vm275_vm4 = vcmp.eq.s32.totalorder %v992_v2, 22  ;;  %vm276_vm5 = vcmp.eq.s32.totalorder %v994_v3, 22  ;;  %s1352_s16 = sld [smem:[#allocation2 + $0x32]] }
  0x64   :  { %v271_v48 = vsel %vm265_vm0, %v270_v47, %v261_v43  ;;  %v272_v49 = vsel %vm266_vm1, %v270_v47, %v262_v44  ;;  %v273_v50 = vsel %vm267_vm2, %v270_v47, %v263_v45  ;;  %v274_v51 = vsel %vm268_vm3, %v270_v47, %v264_v46 }
  0x65   :  { %vm277_vm6 = vcmp.eq.s32.totalorder %v996_v4, 22  ;;  %vm278_vm7 = vcmp.eq.s32.totalorder %v998_v5, 22  ;;  %v280_v52 = vstv %s1156_s17  ;;  %vm285_vm8 = vcmp.eq.s32.totalorder %v992_v2, 23  ;;  %s1358_s17 = sld [smem:[#allocation2 + $0x33]] }
  0x66   :  { %v281_v53 = vsel %vm275_vm4, %v280_v52, %v271_v48  ;;  %v282_v54 = vsel %vm276_vm5, %v280_v52, %v272_v49  ;;  %v283_v55 = vsel %vm277_vm6, %v280_v52, %v273_v50  ;;  %v284_v56 = vsel %vm278_vm7, %v280_v52, %v274_v51 }
  0x67   :  { %vm286_vm9 = vcmp.eq.s32.totalorder %v994_v3, 23  ;;  %vm287_vm10 = vcmp.eq.s32.totalorder %v996_v4, 23  ;;  %vm288_vm11 = vcmp.eq.s32.totalorder %v998_v5, 23  ;;  %v290_v57 = vstv %s1162_s18  ;;  %s1368_s18 = sld [smem:[#allocation2 + $0x34]] }
  0x68   :  { %v291_v58 = vsel %vm285_vm8, %v290_v57, %v281_v53  ;;  %v292_v59 = vsel %vm286_vm9, %v290_v57, %v282_v54  ;;  %v293_v60 = vsel %vm287_vm10, %v290_v57, %v283_v55  ;;  %v294_v61 = vsel %vm288_vm11, %v290_v57, %v284_v56 }
  0x69   :  { %vm295_vm12 = vcmp.eq.s32.totalorder %v992_v2, 24  ;;  %vm296_vm13 = vcmp.eq.s32.totalorder %v994_v3, 24  ;;  %vm297_vm14 = vcmp.eq.s32.totalorder %v996_v4, 24  ;;  %vm298_vm15 = vcmp.eq.s32.totalorder %v998_v5, 24 }
  0x6a   :  { %v300_v62 = vstv %s1172_s19  ;;  %vm305_vm0 = vcmp.eq.s32.totalorder %v992_v2, 25  ;;  %vm306_vm1 = vcmp.eq.s32.totalorder %v994_v3, 25  ;;  %vm307_vm2 = vcmp.eq.s32.totalorder %v996_v4, 25  ;;  %s1374_s19 = sld [smem:[#allocation2 + $0x35]] }
  0x6b   :  { %v301_v63 = vsel %vm295_vm12, %v300_v62, %v291_v58  ;;  %v302_v0 = vsel %vm296_vm13, %v300_v62, %v292_v59  ;;  %v303_v1 = vsel %vm297_vm14, %v300_v62, %v293_v60  ;;  %v304_v6 = vsel %vm298_vm15, %v300_v62, %v294_v61 }
  0x6c   :  { %vm308_vm3 = vcmp.eq.s32.totalorder %v998_v5, 25  ;;  %v310_v7 = vstv %s1178_s20  ;;  %vm315_vm4 = vcmp.eq.s32.totalorder %v992_v2, 26  ;;  %vm316_vm5 = vcmp.eq.s32.totalorder %v994_v3, 26  ;;  %s1380_s20 = sld [smem:[#allocation2 + $0x36]] }
  0x6d   :  { %v311_v8 = vsel %vm305_vm0, %v310_v7, %v301_v63  ;;  %v312_v9 = vsel %vm306_vm1, %v310_v7, %v302_v0  ;;  %v313_v10 = vsel %vm307_vm2, %v310_v7, %v303_v1  ;;  %v314_v11 = vsel %vm308_vm3, %v310_v7, %v304_v6 }
  0x6e   :  { %vm317_vm6 = vcmp.eq.s32.totalorder %v996_v4, 26  ;;  %vm318_vm7 = vcmp.eq.s32.totalorder %v998_v5, 26  ;;  %v320_v12 = vstv %s1184_s21  ;;  %vm325_vm8 = vcmp.eq.s32.totalorder %v992_v2, 27  ;;  %s1386_s21 = sld [smem:[#allocation2 + $0x37]] }
  0x6f   :  { %v321_v13 = vsel %vm315_vm4, %v320_v12, %v311_v8  ;;  %v322_v14 = vsel %vm316_vm5, %v320_v12, %v312_v9  ;;  %v323_v15 = vsel %vm317_vm6, %v320_v12, %v313_v10  ;;  %v324_v16 = vsel %vm318_vm7, %v320_v12, %v314_v11 }
  0x70   :  { %vm326_vm9 = vcmp.eq.s32.totalorder %v994_v3, 27  ;;  %vm327_vm10 = vcmp.eq.s32.totalorder %v996_v4, 27  ;;  %vm328_vm11 = vcmp.eq.s32.totalorder %v998_v5, 27  ;;  %v330_v17 = vstv %s1190_s1  ;;  %s1396_s1 = sld [smem:[#allocation2 + $0x38]] }
  0x71   :  { %v331_v18 = vsel %vm325_vm8, %v330_v17, %v321_v13  ;;  %v332_v19 = vsel %vm326_vm9, %v330_v17, %v322_v14  ;;  %v333_v20 = vsel %vm327_vm10, %v330_v17, %v323_v15  ;;  %v334_v21 = vsel %vm328_vm11, %v330_v17, %v324_v16 }
  0x72   :  { %vm335_vm12 = vcmp.eq.s32.totalorder %v992_v2, 28  ;;  %vm336_vm13 = vcmp.eq.s32.totalorder %v994_v3, 28  ;;  %vm337_vm14 = vcmp.eq.s32.totalorder %v996_v4, 28  ;;  %vm338_vm15 = vcmp.eq.s32.totalorder %v998_v5, 28 }
  0x73   :  { %v340_v22 = vstv %s1200_s22  ;;  %vm345_vm0 = vcmp.eq.s32.totalorder %v992_v2, 29  ;;  %vm346_vm1 = vcmp.eq.s32.totalorder %v994_v3, 29  ;;  %vm347_vm2 = vcmp.eq.s32.totalorder %v996_v4, 29  ;;  %s1402_s22 = sld [smem:[#allocation2 + $0x39]] }
  0x74   :  { %v341_v23 = vsel %vm335_vm12, %v340_v22, %v331_v18  ;;  %v342_v24 = vsel %vm336_vm13, %v340_v22, %v332_v19  ;;  %v343_v25 = vsel %vm337_vm14, %v340_v22, %v333_v20  ;;  %v344_v26 = vsel %vm338_vm15, %v340_v22, %v334_v21 }
  0x75   :  { %vm348_vm3 = vcmp.eq.s32.totalorder %v998_v5, 29  ;;  %v350_v27 = vstv %s1206_s23  ;;  %vm355_vm4 = vcmp.eq.s32.totalorder %v992_v2, 30  ;;  %vm356_vm5 = vcmp.eq.s32.totalorder %v994_v3, 30  ;;  %s1408_s23 = sld [smem:[#allocation2 + $0x3a]] }
  0x76   :  { %v351_v28 = vsel %vm345_vm0, %v350_v27, %v341_v23  ;;  %v352_v29 = vsel %vm346_vm1, %v350_v27, %v342_v24  ;;  %v353_v30 = vsel %vm347_vm2, %v350_v27, %v343_v25  ;;  %v354_v31 = vsel %vm348_vm3, %v350_v27, %v344_v26 }
  0x77   :  { %vm357_vm6 = vcmp.eq.s32.totalorder %v996_v4, 30  ;;  %vm358_vm7 = vcmp.eq.s32.totalorder %v998_v5, 30  ;;  %v360_v32 = vstv %s1212_s24  ;;  %vm365_vm8 = vcmp.eq.s32.totalorder %v992_v2, 31  ;;  %s1414_s24 = sld [smem:[#allocation2 + $0x3b]] }
  0x78   :  { %v361_v33 = vsel %vm355_vm4, %v360_v32, %v351_v28  ;;  %v362_v34 = vsel %vm356_vm5, %v360_v32, %v352_v29  ;;  %v363_v35 = vsel %vm357_vm6, %v360_v32, %v353_v30  ;;  %v364_v36 = vsel %vm358_vm7, %v360_v32, %v354_v31 }
  0x79   :  { %vm366_vm9 = vcmp.eq.s32.totalorder %v994_v3, 31  ;;  %vm367_vm10 = vcmp.eq.s32.totalorder %v996_v4, 31  ;;  %vm368_vm11 = vcmp.eq.s32.totalorder %v998_v5, 31  ;;  %v370_v37 = vstv %s1218_s2  ;;  %s1424_s2 = sld [smem:[#allocation2 + $0x3c]] }
  0x7a   :  { %v371_v38 = vsel %vm365_vm8, %v370_v37, %v361_v33  ;;  %v372_v39 = vsel %vm366_vm9, %v370_v37, %v362_v34  ;;  %v373_v40 = vsel %vm367_vm10, %v370_v37, %v363_v35  ;;  %v374_v41 = vsel %vm368_vm11, %v370_v37, %v364_v36 }
  0x7b   :  { %vm375_vm12 = vcmp.eq.s32.totalorder %v992_v2, 32  ;;  %vm376_vm13 = vcmp.eq.s32.totalorder %v994_v3, 32  ;;  %vm377_vm14 = vcmp.eq.s32.totalorder %v996_v4, 32  ;;  %vm378_vm15 = vcmp.eq.s32.totalorder %v998_v5, 32 }
  0x7c   :  { %v380_v42 = vstv %s1228_s25  ;;  %vm385_vm0 = vcmp.eq.s32.totalorder %v992_v2, 33  ;;  %vm386_vm1 = vcmp.eq.s32.totalorder %v994_v3, 33  ;;  %vm387_vm2 = vcmp.eq.s32.totalorder %v996_v4, 33  ;;  %s1430_s25 = sld [smem:[#allocation2 + $0x3d]] }
  0x7d   :  { %v381_v43 = vsel %vm375_vm12, %v380_v42, %v371_v38  ;;  %v382_v44 = vsel %vm376_vm13, %v380_v42, %v372_v39  ;;  %v383_v45 = vsel %vm377_vm14, %v380_v42, %v373_v40  ;;  %v384_v46 = vsel %vm378_vm15, %v380_v42, %v374_v41 }
  0x7e   :  { %vm388_vm3 = vcmp.eq.s32.totalorder %v998_v5, 33  ;;  %v390_v47 = vstv %s1234_s26  ;;  %vm395_vm4 = vcmp.eq.s32.totalorder %v992_v2, 34  ;;  %vm396_vm5 = vcmp.eq.s32.totalorder %v994_v3, 34  ;;  %s1436_s26 = sld [smem:[#allocation2 + $0x3e]] }
  0x7f   :  { %v391_v48 = vsel %vm385_vm0, %v390_v47, %v381_v43  ;;  %v392_v49 = vsel %vm386_vm1, %v390_v47, %v382_v44  ;;  %v393_v50 = vsel %vm387_vm2, %v390_v47, %v383_v45  ;;  %v394_v51 = vsel %vm388_vm3, %v390_v47, %v384_v46 }
  0x80   :  { %vm397_vm6 = vcmp.eq.s32.totalorder %v996_v4, 34  ;;  %vm398_vm7 = vcmp.eq.s32.totalorder %v998_v5, 34  ;;  %v400_v52 = vstv %s1240_s27  ;;  %vm405_vm8 = vcmp.eq.s32.totalorder %v992_v2, 35  ;;  %s1442_s27 = sld [smem:[#allocation2 + $0x3f]] }
  0x81   :  { %v401_v53 = vsel %vm395_vm4, %v400_v52, %v391_v48  ;;  %v402_v54 = vsel %vm396_vm5, %v400_v52, %v392_v49  ;;  %v403_v55 = vsel %vm397_vm6, %v400_v52, %v393_v50  ;;  %v404_v56 = vsel %vm398_vm7, %v400_v52, %v394_v51 }
  0x82   :  { %vm406_vm9 = vcmp.eq.s32.totalorder %v994_v3, 35  ;;  %vm407_vm10 = vcmp.eq.s32.totalorder %v996_v4, 35  ;;  %vm408_vm11 = vcmp.eq.s32.totalorder %v998_v5, 35  ;;  %v410_v57 = vstv %s1246_s28 }
  0x83   :  { %v411_v58 = vsel %vm405_vm8, %v410_v57, %v401_v53  ;;  %v412_v59 = vsel %vm406_vm9, %v410_v57, %v402_v54  ;;  %v413_v60 = vsel %vm407_vm10, %v410_v57, %v403_v55  ;;  %v414_v61 = vsel %vm408_vm11, %v410_v57, %v404_v56 }
  0x84   :  { %vm415_vm12 = vcmp.eq.s32.totalorder %v992_v2, 36  ;;  %vm416_vm13 = vcmp.eq.s32.totalorder %v994_v3, 36  ;;  %vm417_vm14 = vcmp.eq.s32.totalorder %v996_v4, 36  ;;  %vm418_vm15 = vcmp.eq.s32.totalorder %v998_v5, 36 }
  0x85   :  { %v420_v62 = vstv %s1256_s29  ;;  %vm425_vm0 = vcmp.eq.s32.totalorder %v992_v2, 37  ;;  %vm426_vm1 = vcmp.eq.s32.totalorder %v994_v3, 37  ;;  %vm427_vm2 = vcmp.eq.s32.totalorder %v996_v4, 37 }
  0x86   :  { %v421_v63 = vsel %vm415_vm12, %v420_v62, %v411_v58  ;;  %v422_v0 = vsel %vm416_vm13, %v420_v62, %v412_v59  ;;  %v423_v1 = vsel %vm417_vm14, %v420_v62, %v413_v60  ;;  %v424_v6 = vsel %vm418_vm15, %v420_v62, %v414_v61 }
  0x87   :  { %vm428_vm3 = vcmp.eq.s32.totalorder %v998_v5, 37  ;;  %v430_v7 = vstv %s1262_s30  ;;  %vm435_vm4 = vcmp.eq.s32.totalorder %v992_v2, 38  ;;  %vm436_vm5 = vcmp.eq.s32.totalorder %v994_v3, 38 }
  0x88   :  { %v431_v8 = vsel %vm425_vm0, %v430_v7, %v421_v63  ;;  %v432_v9 = vsel %vm426_vm1, %v430_v7, %v422_v0  ;;  %v433_v10 = vsel %vm427_vm2, %v430_v7, %v423_v1  ;;  %v434_v11 = vsel %vm428_vm3, %v430_v7, %v424_v6 }
  0x89   :  { %vm437_vm6 = vcmp.eq.s32.totalorder %v996_v4, 38  ;;  %vm438_vm7 = vcmp.eq.s32.totalorder %v998_v5, 38  ;;  %v440_v12 = vstv %s1268_s5  ;;  %vm445_vm8 = vcmp.eq.s32.totalorder %v992_v2, 39 }
  0x8a   :  { %v441_v13 = vsel %vm435_vm4, %v440_v12, %v431_v8  ;;  %v442_v14 = vsel %vm436_vm5, %v440_v12, %v432_v9  ;;  %v443_v15 = vsel %vm437_vm6, %v440_v12, %v433_v10  ;;  %v444_v16 = vsel %vm438_vm7, %v440_v12, %v434_v11 }
  0x8b   :  { %vm446_vm9 = vcmp.eq.s32.totalorder %v994_v3, 39  ;;  %vm447_vm10 = vcmp.eq.s32.totalorder %v996_v4, 39  ;;  %vm448_vm11 = vcmp.eq.s32.totalorder %v998_v5, 39  ;;  %v450_v17 = vstv %s1274_s6 }
  0x8c   :  { %v451_v18 = vsel %vm445_vm8, %v450_v17, %v441_v13  ;;  %v452_v19 = vsel %vm446_vm9, %v450_v17, %v442_v14  ;;  %v453_v20 = vsel %vm447_vm10, %v450_v17, %v443_v15  ;;  %v454_v21 = vsel %vm448_vm11, %v450_v17, %v444_v16 }
  0x8d   :  { %vm455_vm12 = vcmp.eq.s32.totalorder %v992_v2, 40  ;;  %vm456_vm13 = vcmp.eq.s32.totalorder %v994_v3, 40  ;;  %vm457_vm14 = vcmp.eq.s32.totalorder %v996_v4, 40  ;;  %vm458_vm15 = vcmp.eq.s32.totalorder %v998_v5, 40 }
  0x8e   :  { %v460_v22 = vstv %s1284_s7  ;;  %vm465_vm0 = vcmp.eq.s32.totalorder %v992_v2, 41  ;;  %vm466_vm1 = vcmp.eq.s32.totalorder %v994_v3, 41  ;;  %vm467_vm2 = vcmp.eq.s32.totalorder %v996_v4, 41 }
  0x8f   :  { %v461_v23 = vsel %vm455_vm12, %v460_v22, %v451_v18  ;;  %v462_v24 = vsel %vm456_vm13, %v460_v22, %v452_v19  ;;  %v463_v25 = vsel %vm457_vm14, %v460_v22, %v453_v20  ;;  %v464_v26 = vsel %vm458_vm15, %v460_v22, %v454_v21 }
  0x90   :  { %vm468_vm3 = vcmp.eq.s32.totalorder %v998_v5, 41  ;;  %v470_v27 = vstv %s1290_s8  ;;  %vm475_vm4 = vcmp.eq.s32.totalorder %v992_v2, 42  ;;  %vm476_vm5 = vcmp.eq.s32.totalorder %v994_v3, 42 }
  0x91   :  { %v471_v28 = vsel %vm465_vm0, %v470_v27, %v461_v23  ;;  %v472_v29 = vsel %vm466_vm1, %v470_v27, %v462_v24  ;;  %v473_v30 = vsel %vm467_vm2, %v470_v27, %v463_v25  ;;  %v474_v31 = vsel %vm468_vm3, %v470_v27, %v464_v26 }
  0x92   :  { %vm477_vm6 = vcmp.eq.s32.totalorder %v996_v4, 42  ;;  %vm478_vm7 = vcmp.eq.s32.totalorder %v998_v5, 42  ;;  %v480_v32 = vstv %s1296_s0  ;;  %vm485_vm8 = vcmp.eq.s32.totalorder %v992_v2, 43 }
  0x93   :  { %v481_v33 = vsel %vm475_vm4, %v480_v32, %v471_v28  ;;  %v482_v34 = vsel %vm476_vm5, %v480_v32, %v472_v29  ;;  %v483_v35 = vsel %vm477_vm6, %v480_v32, %v473_v30  ;;  %v484_v36 = vsel %vm478_vm7, %v480_v32, %v474_v31 }
  0x94   :  { %vm486_vm9 = vcmp.eq.s32.totalorder %v994_v3, 43  ;;  %vm487_vm10 = vcmp.eq.s32.totalorder %v996_v4, 43  ;;  %vm488_vm11 = vcmp.eq.s32.totalorder %v998_v5, 43  ;;  %v490_v37 = vstv %s1302_s9 }
  0x95   :  { %v491_v38 = vsel %vm485_vm8, %v490_v37, %v481_v33  ;;  %v492_v39 = vsel %vm486_vm9, %v490_v37, %v482_v34  ;;  %v493_v40 = vsel %vm487_vm10, %v490_v37, %v483_v35  ;;  %v494_v41 = vsel %vm488_vm11, %v490_v37, %v484_v36 }
  0x96   :  { %vm495_vm12 = vcmp.eq.s32.totalorder %v992_v2, 44  ;;  %vm496_vm13 = vcmp.eq.s32.totalorder %v994_v3, 44  ;;  %vm497_vm14 = vcmp.eq.s32.totalorder %v996_v4, 44  ;;  %vm498_vm15 = vcmp.eq.s32.totalorder %v998_v5, 44 }
  0x97   :  { %v500_v42 = vstv %s1312_s10  ;;  %vm505_vm0 = vcmp.eq.s32.totalorder %v992_v2, 45  ;;  %vm506_vm1 = vcmp.eq.s32.totalorder %v994_v3, 45  ;;  %vm507_vm2 = vcmp.eq.s32.totalorder %v996_v4, 45 }
  0x98   :  { %v501_v43 = vsel %vm495_vm12, %v500_v42, %v491_v38  ;;  %v502_v44 = vsel %vm496_vm13, %v500_v42, %v492_v39  ;;  %v503_v45 = vsel %vm497_vm14, %v500_v42, %v493_v40  ;;  %v504_v46 = vsel %vm498_vm15, %v500_v42, %v494_v41 }
  0x99   :  { %vm508_vm3 = vcmp.eq.s32.totalorder %v998_v5, 45  ;;  %v510_v47 = vstv %s1318_s11  ;;  %vm515_vm4 = vcmp.eq.s32.totalorder %v992_v2, 46  ;;  %vm516_vm5 = vcmp.eq.s32.totalorder %v994_v3, 46 }
  0x9a   :  { %v511_v48 = vsel %vm505_vm0, %v510_v47, %v501_v43  ;;  %v512_v49 = vsel %vm506_vm1, %v510_v47, %v502_v44  ;;  %v513_v50 = vsel %vm507_vm2, %v510_v47, %v503_v45  ;;  %v514_v51 = vsel %vm508_vm3, %v510_v47, %v504_v46 }
  0x9b   :  { %vm517_vm6 = vcmp.eq.s32.totalorder %v996_v4, 46  ;;  %vm518_vm7 = vcmp.eq.s32.totalorder %v998_v5, 46  ;;  %v520_v52 = vstv %s1324_s12  ;;  %vm525_vm8 = vcmp.eq.s32.totalorder %v992_v2, 47 }
  0x9c   :  { %v521_v53 = vsel %vm515_vm4, %v520_v52, %v511_v48  ;;  %v522_v54 = vsel %vm516_vm5, %v520_v52, %v512_v49  ;;  %v523_v55 = vsel %vm517_vm6, %v520_v52, %v513_v50  ;;  %v524_v56 = vsel %vm518_vm7, %v520_v52, %v514_v51 }
  0x9d   :  { %vm526_vm9 = vcmp.eq.s32.totalorder %v994_v3, 47  ;;  %vm527_vm10 = vcmp.eq.s32.totalorder %v996_v4, 47  ;;  %vm528_vm11 = vcmp.eq.s32.totalorder %v998_v5, 47  ;;  %v530_v57 = vstv %s1330_s13 }
  0x9e   :  { %v531_v58 = vsel %vm525_vm8, %v530_v57, %v521_v53  ;;  %v532_v59 = vsel %vm526_vm9, %v530_v57, %v522_v54  ;;  %v533_v60 = vsel %vm527_vm10, %v530_v57, %v523_v55  ;;  %v534_v61 = vsel %vm528_vm11, %v530_v57, %v524_v56 }
  0x9f   :  { %vm535_vm12 = vcmp.eq.s32.totalorder %v992_v2, 48  ;;  %vm536_vm13 = vcmp.eq.s32.totalorder %v994_v3, 48  ;;  %vm537_vm14 = vcmp.eq.s32.totalorder %v996_v4, 48  ;;  %vm538_vm15 = vcmp.eq.s32.totalorder %v998_v5, 48 }
  0xa0   :  { %v540_v62 = vstv %s1340_s14  ;;  %vm545_vm0 = vcmp.eq.s32.totalorder %v992_v2, 49  ;;  %vm546_vm1 = vcmp.eq.s32.totalorder %v994_v3, 49  ;;  %vm547_vm2 = vcmp.eq.s32.totalorder %v996_v4, 49 }
  0xa1   :  { %v541_v63 = vsel %vm535_vm12, %v540_v62, %v531_v58  ;;  %v542_v0 = vsel %vm536_vm13, %v540_v62, %v532_v59  ;;  %v543_v1 = vsel %vm537_vm14, %v540_v62, %v533_v60  ;;  %v544_v6 = vsel %vm538_vm15, %v540_v62, %v534_v61 }
  0xa2   :  { %vm548_vm3 = vcmp.eq.s32.totalorder %v998_v5, 49  ;;  %v550_v7 = vstv %s1346_s15  ;;  %vm555_vm4 = vcmp.eq.s32.totalorder %v992_v2, 50  ;;  %vm556_vm5 = vcmp.eq.s32.totalorder %v994_v3, 50 }
  0xa3   :  { %v551_v8 = vsel %vm545_vm0, %v550_v7, %v541_v63  ;;  %v552_v9 = vsel %vm546_vm1, %v550_v7, %v542_v0  ;;  %v553_v10 = vsel %vm547_vm2, %v550_v7, %v543_v1  ;;  %v554_v11 = vsel %vm548_vm3, %v550_v7, %v544_v6 }
  0xa4   :  { %vm557_vm6 = vcmp.eq.s32.totalorder %v996_v4, 50  ;;  %vm558_vm7 = vcmp.eq.s32.totalorder %v998_v5, 50  ;;  %v560_v12 = vstv %s1352_s16  ;;  %vm565_vm8 = vcmp.eq.s32.totalorder %v992_v2, 51 }
  0xa5   :  { %v561_v13 = vsel %vm555_vm4, %v560_v12, %v551_v8  ;;  %v562_v14 = vsel %vm556_vm5, %v560_v12, %v552_v9  ;;  %v563_v15 = vsel %vm557_vm6, %v560_v12, %v553_v10  ;;  %v564_v16 = vsel %vm558_vm7, %v560_v12, %v554_v11 }
  0xa6   :  { %vm566_vm9 = vcmp.eq.s32.totalorder %v994_v3, 51  ;;  %vm567_vm10 = vcmp.eq.s32.totalorder %v996_v4, 51  ;;  %vm568_vm11 = vcmp.eq.s32.totalorder %v998_v5, 51  ;;  %v570_v17 = vstv %s1358_s17 }
  0xa7   :  { %v571_v18 = vsel %vm565_vm8, %v570_v17, %v561_v13  ;;  %v572_v19 = vsel %vm566_vm9, %v570_v17, %v562_v14  ;;  %v573_v20 = vsel %vm567_vm10, %v570_v17, %v563_v15  ;;  %v574_v21 = vsel %vm568_vm11, %v570_v17, %v564_v16  ;;  %v695_v17 = vld [vmem:[#allocation7] sm:$0xff] }
  0xa8   :  { %vm575_vm12 = vcmp.eq.s32.totalorder %v992_v2, 52  ;;  %vm576_vm13 = vcmp.eq.s32.totalorder %v994_v3, 52  ;;  %vm577_vm14 = vcmp.eq.s32.totalorder %v996_v4, 52  ;;  %vm578_vm15 = vcmp.eq.s32.totalorder %v998_v5, 52 }
  0xa9   :  { %v580_v22 = vstv %s1368_s18  ;;  %vm585_vm0 = vcmp.eq.s32.totalorder %v992_v2, 53  ;;  %vm586_vm1 = vcmp.eq.s32.totalorder %v994_v3, 53  ;;  %vm587_vm2 = vcmp.eq.s32.totalorder %v996_v4, 53 }
  0xaa   :  { %v581_v23 = vsel %vm575_vm12, %v580_v22, %v571_v18  ;;  %v582_v24 = vsel %vm576_vm13, %v580_v22, %v572_v19  ;;  %v583_v25 = vsel %vm577_vm14, %v580_v22, %v573_v20  ;;  %v584_v26 = vsel %vm578_vm15, %v580_v22, %v574_v21  ;;  %v813_v19 = vld [vmem:[%s1482_s3] ss:$0 sm:$0xff]  ;;  %s928_s3 = smov [#allocation9]  }
  0xab   :  { %vm588_vm3 = vcmp.eq.s32.totalorder %v998_v5, 53  ;;  %v590_v27 = vstv %s1374_s19  ;;  %vm595_vm4 = vcmp.eq.s32.totalorder %v992_v2, 54  ;;  %vm596_vm5 = vcmp.eq.s32.totalorder %v994_v3, 54  ;;  %s736_s30 = sshll.u32 %s928_s3, 4  ;;  %s737_s30 = int_to_ptr.vmem [resolvable:$true] %s736_s30 }
  0xac   :  { %v591_v28 = vsel %vm585_vm0, %v590_v27, %v581_v23  ;;  %v592_v29 = vsel %vm586_vm1, %v590_v27, %v582_v24  ;;  %v593_v30 = vsel %vm587_vm2, %v590_v27, %v583_v25  ;;  %v594_v31 = vsel %vm588_vm3, %v590_v27, %v584_v26  ;;  %s893_s5 = scalar_lea.vmem %s737_s30, 512  ;;  %p898_p6 = scmp.lt.s32.totalorder %s737_s30, %s737_s30 }
  0xad   :  { %vm597_vm6 = vcmp.eq.s32.totalorder %v996_v4, 54  ;;  %vm598_vm7 = vcmp.eq.s32.totalorder %v998_v5, 54  ;;  %v600_v32 = vstv %s1380_s20  ;;  %vm605_vm8 = vcmp.eq.s32.totalorder %v992_v2, 55  ;;  %p894_p5 = scmp.ne.s32.totalorder %s737_s30, %s893_s5  ;;  %p899_p7 = scmp.lt.s32.totalorder %s893_s5, %s893_s5 }
  0xae   :  { %v601_v33 = vsel %vm595_vm4, %v600_v32, %v591_v28  ;;  %v602_v34 = vsel %vm596_vm5, %v600_v32, %v592_v29  ;;  %v603_v35 = vsel %vm597_vm6, %v600_v32, %v593_v30  ;;  %v604_v36 = vsel %vm598_vm7, %v600_v32, %v594_v31 }
  0xaf   :  { %vm606_vm9 = vcmp.eq.s32.totalorder %v994_v3, 55  ;;  %vm607_vm10 = vcmp.eq.s32.totalorder %v996_v4, 55  ;;  %vm608_vm11 = vcmp.eq.s32.totalorder %v998_v5, 55  ;;  %v610_v37 = vstv %s1386_s21  ;;  %p900_p8 = por %p899_p7, %p898_p6 }
  0xb0   :  { %v611_v38 = vsel %vm605_vm8, %v610_v37, %v601_v33  ;;  %v612_v39 = vsel %vm606_vm9, %v610_v37, %v602_v34  ;;  %v613_v40 = vsel %vm607_vm10, %v610_v37, %v603_v35  ;;  %v614_v41 = vsel %vm608_vm11, %v610_v37, %v604_v36 }
  0xb1   :  { %vm615_vm12 = vcmp.eq.s32.totalorder %v992_v2, 56  ;;  %vm616_vm13 = vcmp.eq.s32.totalorder %v994_v3, 56  ;;  %vm617_vm14 = vcmp.eq.s32.totalorder %v996_v4, 56  ;;  %vm618_vm15 = vcmp.eq.s32.totalorder %v998_v5, 56  ;;  %p901_p9 = pnand %p900_p8, %p894_p5 }
  0xb2   :  { %v620_v42 = vstv %s1396_s1  ;;  %vm625_vm0 = vcmp.eq.s32.totalorder %v992_v2, 57  ;;  %vm626_vm1 = vcmp.eq.s32.totalorder %v994_v3, 57  ;;  %vm627_vm2 = vcmp.eq.s32.totalorder %v996_v4, 57 }
  0xb3   :  { %v621_v43 = vsel %vm615_vm12, %v620_v42, %v611_v38  ;;  %v622_v44 = vsel %vm616_vm13, %v620_v42, %v612_v39  ;;  %v623_v45 = vsel %vm617_vm14, %v620_v42, %v613_v40  ;;  %v624_v46 = vsel %vm618_vm15, %v620_v42, %v614_v41 }
  0xb4   :  { %vm628_vm3 = vcmp.eq.s32.totalorder %v998_v5, 57  ;;  %v630_v47 = vstv %s1402_s22  ;;  %vm635_vm4 = vcmp.eq.s32.totalorder %v992_v2, 58  ;;  %vm636_vm5 = vcmp.eq.s32.totalorder %v994_v3, 58 }
  0xb5   :  { %v631_v48 = vsel %vm625_vm0, %v630_v47, %v621_v43  ;;  %v632_v49 = vsel %vm626_vm1, %v630_v47, %v622_v44  ;;  %v633_v50 = vsel %vm627_vm2, %v630_v47, %v623_v45  ;;  %v634_v51 = vsel %vm628_vm3, %v630_v47, %v624_v46 }
  0xb6   :  { %vm637_vm6 = vcmp.eq.s32.totalorder %v996_v4, 58  ;;  %vm638_vm7 = vcmp.eq.s32.totalorder %v998_v5, 58  ;;  %v640_v52 = vstv %s1408_s23  ;;  %vm645_vm8 = vcmp.eq.s32.totalorder %v992_v2, 59 }
  0xb7   :  { %v641_v53 = vsel %vm635_vm4, %v640_v52, %v631_v48  ;;  %v642_v54 = vsel %vm636_vm5, %v640_v52, %v632_v49  ;;  %v643_v55 = vsel %vm637_vm6, %v640_v52, %v633_v50  ;;  %v644_v56 = vsel %vm638_vm7, %v640_v52, %v634_v51 }
  0xb8   :  { %vm646_vm9 = vcmp.eq.s32.totalorder %v994_v3, 59  ;;  %vm647_vm10 = vcmp.eq.s32.totalorder %v996_v4, 59  ;;  %vm648_vm11 = vcmp.eq.s32.totalorder %v998_v5, 59  ;;  %v650_v57 = vstv %s1414_s24 }
  0xb9   :  { %v651_v58 = vsel %vm645_vm8, %v650_v57, %v641_v53  ;;  %v652_v59 = vsel %vm646_vm9, %v650_v57, %v642_v54  ;;  %v653_v60 = vsel %vm647_vm10, %v650_v57, %v643_v55  ;;  %v654_v61 = vsel %vm648_vm11, %v650_v57, %v644_v56 }
  0xba   :  { %vm655_vm12 = vcmp.eq.s32.totalorder %v992_v2, 60  ;;  %vm656_vm13 = vcmp.eq.s32.totalorder %v994_v3, 60  ;;  %vm657_vm14 = vcmp.eq.s32.totalorder %v996_v4, 60  ;;  %vm658_vm15 = vcmp.eq.s32.totalorder %v998_v5, 60 }
  0xbb   :  { %v660_v62 = vstv %s1424_s2  ;;  %vm665_vm0 = vcmp.eq.s32.totalorder %v992_v2, 61  ;;  %vm666_vm1 = vcmp.eq.s32.totalorder %v994_v3, 61  ;;  %vm667_vm2 = vcmp.eq.s32.totalorder %v996_v4, 61 }
  0xbc   :  { %v661_v63 = vsel %vm655_vm12, %v660_v62, %v651_v58  ;;  %v662_v0 = vsel %vm656_vm13, %v660_v62, %v652_v59  ;;  %v663_v1 = vsel %vm657_vm14, %v660_v62, %v653_v60  ;;  %v664_v6 = vsel %vm658_vm15, %v660_v62, %v654_v61 }
  0xbd   :  { %vm668_vm3 = vcmp.eq.s32.totalorder %v998_v5, 61  ;;  %v670_v7 = vstv %s1430_s25  ;;  %vm675_vm4 = vcmp.eq.s32.totalorder %v992_v2, 62  ;;  %vm676_vm5 = vcmp.eq.s32.totalorder %v994_v3, 62 }
  0xbe   :  { %v671_v8 = vsel %vm665_vm0, %v670_v7, %v661_v63  ;;  %v672_v9 = vsel %vm666_vm1, %v670_v7, %v662_v0  ;;  %v673_v10 = vsel %vm667_vm2, %v670_v7, %v663_v1  ;;  %v674_v11 = vsel %vm668_vm3, %v670_v7, %v664_v6 }
  0xbf   :  { %vm677_vm6 = vcmp.eq.s32.totalorder %v996_v4, 62  ;;  %vm678_vm7 = vcmp.eq.s32.totalorder %v998_v5, 62  ;;  %v680_v12 = vstv %s1436_s26  ;;  %vm685_vm8 = vcmp.eq.s32.totalorder %v992_v2, 63 }
  0xc0   :  { %v681_v13 = vsel %vm675_vm4, %v680_v12, %v671_v8  ;;  %v682_v14 = vsel %vm676_vm5, %v680_v12, %v672_v9  ;;  %v683_v15 = vsel %vm677_vm6, %v680_v12, %v673_v10  ;;  %v684_v16 = vsel %vm678_vm7, %v680_v12, %v674_v11 }
  0xc1   :  { %vm686_vm9 = vcmp.eq.s32.totalorder %v994_v3, 63  ;;  %vm687_vm10 = vcmp.eq.s32.totalorder %v996_v4, 63  ;;  %vm688_vm11 = vcmp.eq.s32.totalorder %v998_v5, 63  ;;  %v690_v18 = vstv %s1442_s27 }
  0xc2   :  { %v691_v20 = vsel %vm685_vm8, %v690_v18, %v681_v13  ;;  %v692_v21 = vsel %vm686_vm9, %v690_v18, %v682_v14  ;;  %v693_v22 = vsel %vm687_vm10, %v690_v18, %v683_v15  ;;  %v694_v2 = vsel %vm688_vm11, %v690_v18, %v684_v16 }
  0xc3   :  { %v696_v23 = vunpack.c.0.s8 %v695_v17  ;;  %v697_v24 = vunpack.c.1.s8 %v695_v17  ;;  %v698_v25 = vunpack.c.2.s8 %v695_v17  ;;  %v699_v26 = vunpack.c.3.s8 %v695_v17 }
  0xc4   :  { %v711_v27 = vadd.f32 %v813_v19, %v691_v20  ;;  %v712_v28 = vadd.f32 %v813_v19, %v692_v21  ;;  %v713_v3 = vadd.f32 %v813_v19, %v693_v22  ;;  %v714_v29 = vadd.f32 %v813_v19, %v694_v2 }
  0xc5   :  { %v700_v4 = vcvt.s32.f32 %v696_v23  ;;  %v701_v30 = vcvt.s32.f32 %v697_v24  ;;  %v702_v5 = vcvt.s32.f32 %v698_v25  ;;  %v703_v31 = vcvt.s32.f32 %v699_v26 }
  0xc7   :  { %v715_v32 = vmul.f32 %v711_v27, %v700_v4  ;;  %v716_v33 = vmul.f32 %v712_v28, %v701_v30  ;;  %v717_v34 = vmul.f32 %v713_v3, %v702_v5  ;;  %v718_v35 = vmul.f32 %v714_v29, %v703_v31 }
  0xc9   :  { %v719_v36 = vmul.f32 1.442695, %v715_v32  ;;  %v721_v37 = vmul.f32 1.442695, %v716_v33  ;;  %v723_v38 = vmul.f32 1.442695, %v717_v34 }
  0xca   :  { %v725_v39 = vmul.f32 1.442695, %v718_v35 }
  0xcb   :  { %831 = vpow2.f32 %v719_v36 }
  0xcc   :  { %833 = vpow2.f32 %v721_v37 }
  0xcd   :  { %835 = vpow2.f32 %v723_v38 }
  0xce   :  { %837 = vpow2.f32 %v725_v39 }
  0xd5   :  { %v832_v40 = vpop.eup %831 }
  0xd6   :  { %v834_v41 = vpop.eup %833  ;;  %727 = vst [vmem:[#allocation9] sm:$0xff] %v832_v40 }
  0xd7   :  { %v836_v42 = vpop.eup %835  ;;  %728 = vst [vmem:[#allocation9 + $0x8] sm:$0xff] %v834_v41 }
  0xd8   :  { %v838_v43 = vpop.eup %837  ;;  %729 = vst [vmem:[#allocation9 + $0x10] sm:$0xff] %v836_v42 }
  0xd9   :  { %730 = vst [vmem:[#allocation9 + $0x18] sm:$0xff] %v838_v43 }
  0xda   :  { %904 = shalt.err (!%p901_p9)
}
  0xdb   :  { %s905_s8 = scalar_lea.hbm %s1483_s4, 512 }
  0xdc   :  { %p906_p10 = scmp.ne.s32.totalorder %s1483_s4, %s905_s8  ;;  %p909_p11 = scmp.lt.u32.totalorder %s905_s8, %s1483_s4 }
  0xde   :  { %p911_p12 = pnand %p909_p11, %p906_p10 }
  0xe0   :  { %914 = shalt.err (!%p911_p12)
}
  0xe1   :  { %s929_s12 = smov 128   ;;  %s930_s13 = smov 8  }
  0xe2   :  { %742 = dma.vmem_to_hbm [thread:$0]  %s737_s30, 512, %s1483_s4, [#allocation4], %s929_s12, %s929_s12, %s930_s13  }
  0xe3   :  { %921 = dma.done.wait [#allocation4], 512  }
  0xe4   :  { %922 = vsyncadd [#allocation4], 4294966784 }
  0xe5   :  { %746 = vsyncpa [#allocation3], 1 }
  0xe6   :  { %747 = vsyncpa [#allocation8], 1 }
  0xe7   :  { %748 = vsyncpa [#allocation4], 1 }
  0xe8   :  { %749 = vsyncpa [#allocation5], 1 }

</bundles_post_ra>
